<compile_context>
chip_gen: v6e
topology: v6e:2x2x1
jax: 0.10.0
libtpu: 0.0.40
codegen_flags: <defaults>
</compile_context>

<pallas_src>
import jax
import jax.numpy as jnp
from jax import lax
from jax.experimental import pallas as pl
from jax.experimental.pallas import tpu as pltpu

# ---- small, forward-consistent hyperparameters -----------------------------
VOCAB = 64
CTX = 8            # context_size (T used below)
N_EMBED = 32       # n_embed (C)
N_HEADS = 4        # num_heads
N_LAYERS = 2       # num_layers
HEAD = N_EMBED // N_HEADS          # 8
HIDDEN = 4 * N_EMBED               # 128
V_PAD = 128                        # lane-dense logits width (sliced to VOCAB in wrapper)
EPS = 1e-5                         # torch.nn.LayerNorm default eps


def _layernorm(x, g, b):
    # one-pass variance: E[x^2] - E[x]^2 (both reductions independent)
    mu = jnp.mean(x, axis=-1, keepdims=True)
    ms = jnp.mean(x * x, axis=-1, keepdims=True)
    var = ms - mu * mu
    return (x - mu) * lax.rsqrt(var + EPS) * g + b


# ---------------- Pallas kernel: full GPT forward (all layers + head) --------
def gpt_kernel(idx_ref, tok_ref, pos_ref, wqkv_ref, wo_ref, w1_ref, w2_ref,
               vecs_ref, b1_ref, lnf_ref, wh_ref, bh_ref, o_ref):
    Bb, T, _ = o_ref.shape                    # per-grid-step batch block
    C = N_EMBED
    N = Bb * T
    bf16 = jnp.bfloat16

    # --- fused embedding: one-hot gather on the MXU + positional add ---------
    ids = idx_ref[...]                                         # (Bb, T, 1) int32
    vocab_iota = lax.broadcasted_iota(jnp.int32, (Bb, T, VOCAB), 2)
    onehot = (ids == vocab_iota).astype(jnp.float32)           # (Bb, T, VOCAB)
    tok = jnp.dot(onehot.reshape(N, VOCAB).astype(bf16), tok_ref[...],
                  preferred_element_type=jnp.float32)          # (N, C) exact pick
    x = (tok.reshape(Bb, T, C) + pos_ref[0:T, :][None]).reshape(N, C)

    # --- additive causal mask built once, reused by every layer --------------
    row = lax.broadcasted_iota(jnp.int32, (T, T), 0)
    col = lax.broadcasted_iota(jnp.int32, (T, T), 1)
    addmask = jnp.where(row >= col, 0.0, -1e30).astype(jnp.float32)[None]  # (1,T,T)

    for l in range(N_LAYERS):                                  # static unroll
        wqkv = wqkv_ref[l]                                     # (C, 3C)  bf16 (Q pre-scaled)
        wo = wo_ref[l]                                         # (C, C)   bf16
        w1 = w1_ref[l]                                         # (C, HID) bf16
        w2 = w2_ref[l]                                         # (HID, C) bf16
        vecs = vecs_ref[l]                                     # (6, C)   f32 packed vectors
        ln1_g, ln1_b = vecs[0:1], vecs[1:2]
        ln2_g, ln2_b = vecs[2:3], vecs[3:4]
        bo, b2 = vecs[4:5], vecs[5:6]
        b1 = b1_ref[l]                                         # (1, HID) f32

        # --- multi-head causal self-attention on LN1(x), batched over heads --
        h = _layernorm(x, ln1_g, ln1_b)                        # (N, C) f32
        qkv = jnp.dot(h.astype(bf16), wqkv,
                      preferred_element_type=jnp.float32)      # (N, 3C) f32

        # head-major stacks: (H, N, D) -> (H*Bb, T, D); one softmax for all heads
        q = jnp.stack([qkv[:, hh * HEAD:(hh + 1) * HEAD]
                       for hh in range(N_HEADS)], axis=0).reshape(N_HEADS * Bb, T, HEAD)
        k = jnp.stack([qkv[:, C + hh * HEAD:C + (hh + 1) * HEAD]
                       for hh in range(N_HEADS)], axis=0).reshape(N_HEADS * Bb, T, HEAD)
        v = jnp.stack([qkv[:, 2 * C + hh * HEAD:2 * C + (hh + 1) * HEAD]
                       for hh in range(N_HEADS)], axis=0).reshape(N_HEADS * Bb, T, HEAD)

        scores = jnp.einsum('nqd,nkd->nqk', q.astype(bf16), k.astype(bf16),
                            preferred_element_type=jnp.float32)    # (H*Bb, T, T)
        scores = scores + addmask
        m = jnp.max(scores, axis=-1, keepdims=True)
        p = jnp.exp(scores - m)
        denom = jnp.sum(p, axis=-1, keepdims=True)
        p = p * pl.reciprocal(denom, approx=True)              # divide on the EUP slot

        o = jnp.einsum('nqk,nkd->nqd', p.astype(bf16), v.astype(bf16),
                       preferred_element_type=jnp.float32)     # (H*Bb, T, D)
        o = o.reshape(N_HEADS, N, HEAD)
        att = jnp.concatenate([o[hh] for hh in range(N_HEADS)], axis=-1)  # (N, C) head-major
        sa = jnp.dot(att.astype(bf16), wo,
                     preferred_element_type=jnp.float32)       # single K=32 out-projection
        x = x + sa + bo                                        # residual 1 (+ folded bias)

        # --- feed-forward on LN2(x): Linear -> ReLU -> Linear -----------------
        h2 = _layernorm(x, ln2_g, ln2_b)
        ff = jnp.dot(h2.astype(bf16), w1, preferred_element_type=jnp.float32) + b1
        ff = jnp.maximum(ff, 0.0)
        x = x + jnp.dot(ff.astype(bf16), w2,
                        preferred_element_type=jnp.float32) + b2   # residual 2

    # --- final LayerNorm + LM head (lane-dense padded logits) ----------------
    lnf = lnf_ref[...]                                         # (2, C)
    hf = _layernorm(x, lnf[0:1], lnf[1:2])
    logits = jnp.dot(hf.astype(bf16), wh_ref[...],
                     preferred_element_type=jnp.float32) + bh_ref[...]
    o_ref[...] = logits.reshape(Bb, T, V_PAD)


# ---------------- wrapper -----------------------------------------------------
def _full_spec(a):
    nd = a.ndim
    return pl.BlockSpec(a.shape, lambda i, _nd=nd: (0,) * _nd)


def _num_batch_blocks(B):
    # v7x has 2 TensorCores per chip: split the batch across a parallel grid
    # axis there.  Single-TC chips (v5e/v6e) keep one fused grid step.
    try:
        kind = jax.devices()[0].device_kind.lower()
    except Exception:
        return 1
    if ("v7" in kind or "tpu7" in kind) and B % 2 == 0:
        return 2
    return 1


def camoes_gpt_forward(params, idx):
    # idx: (B, T) int32; targets=None branch -> loss is None
    B, T = idx.shape
    G = _num_batch_blocks(B)
    Bb = B // G
    idx3 = idx.astype(jnp.int32)[:, :, None]                   # (B, T, 1) lane-dim 1

    ins = (idx3, params["tok_emb"], params["pos_emb"], params["w_qkv"],
           params["wo"], params["w1"], params["w2"], params["vecs"],
           params["b1"], params["lnf"], params["w_head"], params["b_head"])

    in_specs = [pl.BlockSpec((Bb, T, 1), lambda i: (i, 0, 0))]      # idx blocked on B
    in_specs += [_full_spec(a) for a in ins[1:]]                    # everything else resident

    logits_pad = pl.pallas_call(
        gpt_kernel,
        out_shape=jax.ShapeDtypeStruct((B, T, V_PAD), jnp.float32),
        grid=(G,),
        in_specs=in_specs,
        out_specs=pl.BlockSpec((Bb, T, V_PAD), lambda i: (i, 0, 0)),
        compiler_params=pltpu.CompilerParams(
            dimension_semantics=("parallel",)),
    )(*ins)
    return logits_pad[:, :, :VOCAB], None


# ---------------- deterministic parameter init (packed layout) ---------------
def init_params(key):
    def nrm(k, shape, scale=0.02):
        return scale * jax.random.normal(k, shape, dtype=jnp.float32)

    keys = jax.random.split(key, 3 + N_LAYERS)
    ones_c = jnp.ones((N_EMBED,), jnp.float32)
    zeros_c = jnp.zeros((N_EMBED,), jnp.float32)

    w_qkv, wo, w1, w2, vecs, b1 = [], [], [], [], [], []
    for l in range(N_LAYERS):
        ks = jax.random.split(keys[3 + l], 6)
        wq = nrm(ks[0], (N_EMBED, N_EMBED)) * (HEAD ** -0.5)   # fold attention scale
        wk = nrm(ks[1], (N_EMBED, N_EMBED))
        wv = nrm(ks[2], (N_EMBED, N_EMBED))
        w_qkv.append(jnp.concatenate([wq, wk, wv], axis=1))    # (C, 3C) fused QKV
        wo.append(nrm(ks[3], (N_EMBED, N_EMBED)))
        w1.append(nrm(ks[4], (N_EMBED, HIDDEN)))
        w2.append(nrm(ks[5], (HIDDEN, N_EMBED)))
        # packed per-layer vectors: [ln1_g, ln1_b, ln2_g, ln2_b, bo, b2]
        vecs.append(jnp.stack([ones_c, zeros_c, ones_c, zeros_c, zeros_c, zeros_c]))
        b1.append(jnp.zeros((1, HIDDEN), jnp.float32))

    w_head = nrm(keys[2], (N_EMBED, VOCAB))
    w_head_pad = jnp.zeros((N_EMBED, V_PAD), jnp.float32).at[:, :VOCAB].set(w_head)

    bf = jnp.bfloat16
    return {
        # MXU-operand weights stored bf16 (f32 accumulation in-kernel)
        "tok_emb": nrm(keys[0], (VOCAB, N_EMBED)).astype(bf),
        "pos_emb": nrm(keys[1], (CTX, N_EMBED)),               # f32 (added, not matmul'd)
        "w_qkv": jnp.stack(w_qkv).astype(bf),                  # (L, C, 3C)
        "wo": jnp.stack(wo).astype(bf),                        # (L, C, C)
        "w1": jnp.stack(w1).astype(bf),                        # (L, C, HIDDEN)
        "w2": jnp.stack(w2).astype(bf),                        # (L, HIDDEN, C)
        "vecs": jnp.stack(vecs),                               # (L, 6, C) f32
        "b1": jnp.stack(b1),                                   # (L, 1, HIDDEN) f32
        "lnf": jnp.stack([ones_c, zeros_c]),                   # (2, C) f32
        "w_head": w_head_pad.astype(bf),                       # (C, V_PAD) lane-dense
        "b_head": jnp.zeros((1, V_PAD), jnp.float32),          # (1, V_PAD)
    }
    # TODO(synk): training path (cross_entropy loss when targets != None),
    # dropout masks, and generate()'s multinomial sampling loop are not
    # implemented; forward is inference semantics.


# ---------------- pure-JAX reference (for correctness check) -----------------
def reference_forward(params, idx):
    f32 = jnp.float32
    B, T = idx.shape
    x = jnp.take(params["tok_emb"].astype(f32), idx, axis=0) + params["pos_emb"][:T][None]
    causal = jnp.arange(T)[:, None] >= jnp.arange(T)[None, :]
    for l in range(N_LAYERS):
        vv = params["vecs"][l]
        wqkv = params["w_qkv"][l].astype(f32)
        wo = params["wo"][l].astype(f32)
        w1 = params["w1"][l].astype(f32)
        w2 = params["w2"][l].astype(f32)
        h = _layernorm(x, vv[0], vv[1])
        qkv = h @ wqkv
        outs = []
        for hh in range(N_HEADS):
            s = hh * HEAD
            qh = qkv[..., s:s + HEAD]
            kh = qkv[..., N_EMBED + s:N_EMBED + s + HEAD]
            vh = qkv[..., 2 * N_EMBED + s:2 * N_EMBED + s + HEAD]
            att = jnp.einsum('bqd,bkd->bqk', qh, kh)
            att = jax.nn.softmax(jnp.where(causal, att, -jnp.inf), axis=-1)
            outs.append(jnp.einsum('bqk,bkd->bqd', att, vh))
        x = x + jnp.concatenate(outs, axis=-1) @ wo + vv[4]
        h2 = _layernorm(x, vv[2], vv[3])
        ff = jnp.maximum(h2 @ w1 + params["b1"][l, 0], 0.0)
        x = x + ff @ w2 + vv[5]
    hf = _layernorm(x, params["lnf"][0], params["lnf"][1])
    logits = hf @ params["w_head"].astype(f32) + params["b_head"][0]
    return logits[..., :VOCAB]


if __name__ == "__main__":
    key = jax.random.PRNGKey(0)
    pkey, ikey = jax.random.split(key)
    params = init_params(pkey)

    B, T = 2, CTX
    idx = jax.random.randint(ikey, (B, T), 0, VOCAB, dtype=jnp.int32)

    logits, loss = camoes_gpt_forward(params, idx)
    logits = jax.block_until_ready(logits)

    assert logits.shape == (B, T, VOCAB), logits.shape
    assert loss is None
    assert bool(jnp.all(jnp.isfinite(logits)))

    ref = reference_forward(params, idx)
    max_diff = float(jnp.max(jnp.abs(logits - ref)))
    # bf16 MXU operands + approx reciprocal vs all-f32 reference: expect ~1e-3.
    assert max_diff < 1e-2, f"mismatch vs reference: {max_diff}"

    print("KERNEL_OK")
</pallas_src>

<mosaic_0001>
module attributes {stable_mosaic.version = 11 : i64} {
  func.func @gpt_kernel(%arg0: i32, %arg1: memref<2x8x1xi32, #tpu.memory_space<vmem>>, %arg2: memref<64x32xbf16, #tpu.memory_space<vmem>>, %arg3: memref<8x32xf32, #tpu.memory_space<vmem>>, %arg4: memref<2x32x96xbf16, #tpu.memory_space<vmem>>, %arg5: memref<2x32x32xbf16, #tpu.memory_space<vmem>>, %arg6: memref<2x32x128xbf16, #tpu.memory_space<vmem>>, %arg7: memref<2x128x32xbf16, #tpu.memory_space<vmem>>, %arg8: memref<2x6x32xf32, #tpu.memory_space<vmem>>, %arg9: memref<2x1x128xf32, #tpu.memory_space<vmem>>, %arg10: memref<2x32xf32, #tpu.memory_space<vmem>>, %arg11: memref<32x128xbf16, #tpu.memory_space<vmem>>, %arg12: memref<1x128xf32, #tpu.memory_space<vmem>>, %arg13: memref<2x8x128xf32, #tpu.memory_space<vmem>>) attributes {dimension_semantics = [#tpu.dimension_semantics<parallel>], iteration_bounds = array<i64: 1>, scalar_prefetch = 0 : i64, scratch_operands = 0 : i64, tpu.core_type = #tpu.core_type<tc>, window_params = [{transform_indices = @transform_0, window_bounds = array<i64: 2, 8, 1>}, {pipeline_mode = #tpu.pipeline_mode<synchronous>, transform_indices = @transform_1, window_bounds = array<i64: 64, 32>}, {pipeline_mode = #tpu.pipeline_mode<synchronous>, transform_indices = @transform_2, window_bounds = array<i64: 8, 32>}, {pipeline_mode = #tpu.pipeline_mode<synchronous>, transform_indices = @transform_3, window_bounds = array<i64: 2, 32, 96>}, {pipeline_mode = #tpu.pipeline_mode<synchronous>, transform_indices = @transform_4, window_bounds = array<i64: 2, 32, 32>}, {pipeline_mode = #tpu.pipeline_mode<synchronous>, transform_indices = @transform_5, window_bounds = array<i64: 2, 32, 128>}, {pipeline_mode = #tpu.pipeline_mode<synchronous>, transform_indices = @transform_6, window_bounds = array<i64: 2, 128, 32>}, {pipeline_mode = #tpu.pipeline_mode<synchronous>, transform_indices = @transform_7, window_bounds = array<i64: 2, 6, 32>}, {pipeline_mode = #tpu.pipeline_mode<synchronous>, transform_indices = @transform_8, window_bounds = array<i64: 2, 1, 128>}, {pipeline_mode = #tpu.pipeline_mode<synchronous>, transform_indices = @transform_9, window_bounds = array<i64: 2, 32>}, {pipeline_mode = #tpu.pipeline_mode<synchronous>, transform_indices = @transform_10, window_bounds = array<i64: 32, 128>}, {pipeline_mode = #tpu.pipeline_mode<synchronous>, transform_indices = @transform_11, window_bounds = array<i64: 1, 128>}, {transform_indices = @transform_12, window_bounds = array<i64: 2, 8, 128>}]} {
    %c0 = arith.constant 0 : index
    %c0_0 = arith.constant 0 : index
    %c0_1 = arith.constant 0 : index
    %0 = vector.load %arg1[%c0, %c0_0, %c0_1] : memref<2x8x1xi32, #tpu.memory_space<vmem>>, vector<2x8x1xi32>
    %1 = tpu.iota {dimensions = array<i32: 2>} : vector<2x8x64xi32>
    %2 = vector.broadcast %0 : vector<2x8x1xi32> to vector<2x8x64xi32>
    %3 = arith.cmpi eq, %2, %1 : vector<2x8x64xi32>
    %4 = arith.extui %3 : vector<2x8x64xi1> to vector<2x8x64xi32>
    %5 = arith.sitofp %4 : vector<2x8x64xi32> to vector<2x8x64xf32>
    %6 = vector.shape_cast %5 : vector<2x8x64xf32> to vector<16x64xf32>
    %7 = arith.truncf %6 : vector<16x64xf32> to vector<16x64xbf16>
    %c0_2 = arith.constant 0 : index
    %c0_3 = arith.constant 0 : index
    %8 = vector.load %arg2[%c0_2, %c0_3] : memref<64x32xbf16, #tpu.memory_space<vmem>>, vector<64x32xbf16>
    %cst = arith.constant dense<0.000000e+00> : vector<16x32xf32>
    %9 = tpu.matmul %7, %8, %cst {dimension_numbers = #tpu.dot_dimension_numbers<[1], [0], [0], [1], [0, 0, 1, 1], [], []>} : vector<16x64xbf16>, vector<64x32xbf16>, vector<16x32xf32> -> vector<16x32xf32>
    %10 = vector.shape_cast %9 : vector<16x32xf32> to vector<2x8x32xf32>
    %c0_4 = arith.constant 0 : index
    %c0_5 = arith.constant 0 : index
    %11 = vector.load %arg3[%c0_4, %c0_5] : memref<8x32xf32, #tpu.memory_space<vmem>>, vector<8x32xf32>
    %12 = vector.shape_cast %11 : vector<8x32xf32> to vector<1x8x32xf32>
    %13 = vector.broadcast %12 : vector<1x8x32xf32> to vector<2x8x32xf32>
    %14 = arith.addf %10, %13 : vector<2x8x32xf32>
    %15 = vector.shape_cast %14 : vector<2x8x32xf32> to vector<16x32xf32>
    %16 = tpu.iota {dimensions = array<i32: 0>} : vector<8x8xi32>
    %17 = tpu.iota {dimensions = array<i32: 1>} : vector<8x8xi32>
    %18 = arith.cmpi sge, %16, %17 : vector<8x8xi32>
    %cst_6 = arith.constant 0.000000e+00 : f32
    %cst_7 = arith.constant -1.000000e+30 : f32
    %19 = vector.broadcast %cst_6 : f32 to vector<8x8xf32>
    %20 = vector.broadcast %cst_7 : f32 to vector<8x8xf32>
    %21 = arith.select %18, %19, %20 : vector<8x8xi1>, vector<8x8xf32>
    %22 = vector.shape_cast %21 : vector<8x8xf32> to vector<1x8x8xf32>
    %c0_8 = arith.constant 0 : index
    %c0_9 = arith.constant 0 : index
    %c0_10 = arith.constant 0 : index
    %23 = vector.load %arg4[%c0_8, %c0_9, %c0_10] : memref<2x32x96xbf16, #tpu.memory_space<vmem>>, vector<1x32x96xbf16>
    %24 = vector.shape_cast %23 : vector<1x32x96xbf16> to vector<32x96xbf16>
    %c0_11 = arith.constant 0 : index
    %c0_12 = arith.constant 0 : index
    %c0_13 = arith.constant 0 : index
    %25 = vector.load %arg5[%c0_11, %c0_12, %c0_13] : memref<2x32x32xbf16, #tpu.memory_space<vmem>>, vector<1x32x32xbf16>
    %26 = vector.shape_cast %25 : vector<1x32x32xbf16> to vector<32x32xbf16>
    %c0_14 = arith.constant 0 : index
    %c0_15 = arith.constant 0 : index
    %c0_16 = arith.constant 0 : index
    %27 = vector.load %arg6[%c0_14, %c0_15, %c0_16] : memref<2x32x128xbf16, #tpu.memory_space<vmem>>, vector<1x32x128xbf16>
    %28 = vector.shape_cast %27 : vector<1x32x128xbf16> to vector<32x128xbf16>
    %c0_17 = arith.constant 0 : index
    %c0_18 = arith.constant 0 : index
    %c0_19 = arith.constant 0 : index
    %29 = vector.load %arg7[%c0_17, %c0_18, %c0_19] : memref<2x128x32xbf16, #tpu.memory_space<vmem>>, vector<1x128x32xbf16>
    %30 = vector.shape_cast %29 : vector<1x128x32xbf16> to vector<128x32xbf16>
    %c0_20 = arith.constant 0 : index
    %c0_21 = arith.constant 0 : index
    %c0_22 = arith.constant 0 : index
    %31 = vector.load %arg8[%c0_20, %c0_21, %c0_22] : memref<2x6x32xf32, #tpu.memory_space<vmem>>, vector<1x6x32xf32>
    %32 = vector.shape_cast %31 : vector<1x6x32xf32> to vector<6x32xf32>
    %33 = vector.extract_strided_slice %32 {offsets = [0, 0], sizes = [1, 32], strides = [1, 1]} : vector<6x32xf32> to vector<1x32xf32>
    %34 = vector.extract_strided_slice %32 {offsets = [1, 0], sizes = [1, 32], strides = [1, 1]} : vector<6x32xf32> to vector<1x32xf32>
    %35 = vector.extract_strided_slice %32 {offsets = [2, 0], sizes = [1, 32], strides = [1, 1]} : vector<6x32xf32> to vector<1x32xf32>
    %36 = vector.extract_strided_slice %32 {offsets = [3, 0], sizes = [1, 32], strides = [1, 1]} : vector<6x32xf32> to vector<1x32xf32>
    %37 = vector.extract_strided_slice %32 {offsets = [4, 0], sizes = [1, 32], strides = [1, 1]} : vector<6x32xf32> to vector<1x32xf32>
    %38 = vector.extract_strided_slice %32 {offsets = [5, 0], sizes = [1, 32], strides = [1, 1]} : vector<6x32xf32> to vector<1x32xf32>
    %c0_23 = arith.constant 0 : index
    %c0_24 = arith.constant 0 : index
    %c0_25 = arith.constant 0 : index
    %39 = vector.load %arg9[%c0_23, %c0_24, %c0_25] : memref<2x1x128xf32, #tpu.memory_space<vmem>>, vector<1x1x128xf32>
    %40 = vector.shape_cast %39 : vector<1x1x128xf32> to vector<1x128xf32>
    %cst_26 = arith.constant dense<0.000000e+00> : vector<16xf32>
    %41 = vector.multi_reduction <add>, %15, %cst_26 [1] : vector<16x32xf32> to vector<16xf32>
    %42 = vector.shape_cast %41 : vector<16xf32> to vector<16x1xf32>
    %cst_27 = arith.constant 3.200000e+01 : f32
    %43 = vector.broadcast %cst_27 : f32 to vector<16x1xf32>
    %44 = arith.divf %42, %43 : vector<16x1xf32>
    %45 = arith.mulf %15, %15 : vector<16x32xf32>
    %cst_28 = arith.constant dense<0.000000e+00> : vector<16xf32>
    %46 = vector.multi_reduction <add>, %45, %cst_28 [1] : vector<16x32xf32> to vector<16xf32>
    %47 = vector.shape_cast %46 : vector<16xf32> to vector<16x1xf32>
    %cst_29 = arith.constant 3.200000e+01 : f32
    %48 = vector.broadcast %cst_29 : f32 to vector<16x1xf32>
    %49 = arith.divf %47, %48 : vector<16x1xf32>
    %50 = arith.mulf %44, %44 : vector<16x1xf32>
    %51 = arith.subf %49, %50 : vector<16x1xf32>
    %52 = vector.broadcast %44 : vector<16x1xf32> to vector<16x32xf32>
    %53 = arith.subf %15, %52 : vector<16x32xf32>
    %cst_30 = arith.constant 9.99999974E-6 : f32
    %54 = vector.broadcast %cst_30 : f32 to vector<16x1xf32>
    %55 = arith.addf %51, %54 : vector<16x1xf32>
    %56 = math.rsqrt %55 : vector<16x1xf32>
    %57 = vector.broadcast %56 : vector<16x1xf32> to vector<16x32xf32>
    %58 = arith.mulf %53, %57 : vector<16x32xf32>
    %59 = vector.broadcast %33 : vector<1x32xf32> to vector<16x32xf32>
    %60 = arith.mulf %58, %59 : vector<16x32xf32>
    %61 = vector.broadcast %34 : vector<1x32xf32> to vector<16x32xf32>
    %62 = arith.addf %60, %61 : vector<16x32xf32>
    %63 = arith.truncf %62 : vector<16x32xf32> to vector<16x32xbf16>
    %cst_31 = arith.constant dense<0.000000e+00> : vector<16x96xf32>
    %64 = tpu.matmul %63, %24, %cst_31 {dimension_numbers = #tpu.dot_dimension_numbers<[1], [0], [0], [1], [0, 0, 1, 1], [], []>} : vector<16x32xbf16>, vector<32x96xbf16>, vector<16x96xf32> -> vector<16x96xf32>
    %65 = vector.extract_strided_slice %64 {offsets = [0, 0], sizes = [16, 8], strides = [1, 1]} : vector<16x96xf32> to vector<16x8xf32>
    %66 = vector.extract_strided_slice %64 {offsets = [0, 8], sizes = [16, 8], strides = [1, 1]} : vector<16x96xf32> to vector<16x8xf32>
    %67 = vector.extract_strided_slice %64 {offsets = [0, 16], sizes = [16, 8], strides = [1, 1]} : vector<16x96xf32> to vector<16x8xf32>
    %68 = vector.extract_strided_slice %64 {offsets = [0, 24], sizes = [16, 8], strides = [1, 1]} : vector<16x96xf32> to vector<16x8xf32>
    %69 = vector.shape_cast %65 : vector<16x8xf32> to vector<1x16x8xf32>
    %70 = vector.shape_cast %66 : vector<16x8xf32> to vector<1x16x8xf32>
    %71 = vector.shape_cast %67 : vector<16x8xf32> to vector<1x16x8xf32>
    %72 = vector.shape_cast %68 : vector<16x8xf32> to vector<1x16x8xf32>
    %73 = tpu.concatenate %69, %70, %71, %72 in 0 : vector<1x16x8xf32>, vector<1x16x8xf32>, vector<1x16x8xf32>, vector<1x16x8xf32> -> vector<4x16x8xf32>
    %74 = vector.shape_cast %73 : vector<4x16x8xf32> to vector<8x8x8xf32>
    %75 = vector.extract_strided_slice %64 {offsets = [0, 32], sizes = [16, 8], strides = [1, 1]} : vector<16x96xf32> to vector<16x8xf32>
    %76 = vector.extract_strided_slice %64 {offsets = [0, 40], sizes = [16, 8], strides = [1, 1]} : vector<16x96xf32> to vector<16x8xf32>
    %77 = vector.extract_strided_slice %64 {offsets = [0, 48], sizes = [16, 8], strides = [1, 1]} : vector<16x96xf32> to vector<16x8xf32>
    %78 = vector.extract_strided_slice %64 {offsets = [0, 56], sizes = [16, 8], strides = [1, 1]} : vector<16x96xf32> to vector<16x8xf32>
    %79 = vector.shape_cast %75 : vector<16x8xf32> to vector<1x16x8xf32>
    %80 = vector.shape_cast %76 : vector<16x8xf32> to vector<1x16x8xf32>
    %81 = vector.shape_cast %77 : vector<16x8xf32> to vector<1x16x8xf32>
    %82 = vector.shape_cast %78 : vector<16x8xf32> to vector<1x16x8xf32>
    %83 = tpu.concatenate %79, %80, %81, %82 in 0 : vector<1x16x8xf32>, vector<1x16x8xf32>, vector<1x16x8xf32>, vector<1x16x8xf32> -> vector<4x16x8xf32>
    %84 = vector.shape_cast %83 : vector<4x16x8xf32> to vector<8x8x8xf32>
    %85 = vector.extract_strided_slice %64 {offsets = [0, 64], sizes = [16, 8], strides = [1, 1]} : vector<16x96xf32> to vector<16x8xf32>
    %86 = vector.extract_strided_slice %64 {offsets = [0, 72], sizes = [16, 8], strides = [1, 1]} : vector<16x96xf32> to vector<16x8xf32>
    %87 = vector.extract_strided_slice %64 {offsets = [0, 80], sizes = [16, 8], strides = [1, 1]} : vector<16x96xf32> to vector<16x8xf32>
    %88 = vector.extract_strided_slice %64 {offsets = [0, 88], sizes = [16, 8], strides = [1, 1]} : vector<16x96xf32> to vector<16x8xf32>
    %89 = vector.shape_cast %85 : vector<16x8xf32> to vector<1x16x8xf32>
    %90 = vector.shape_cast %86 : vector<16x8xf32> to vector<1x16x8xf32>
    %91 = vector.shape_cast %87 : vector<16x8xf32> to vector<1x16x8xf32>
    %92 = vector.shape_cast %88 : vector<16x8xf32> to vector<1x16x8xf32>
    %93 = tpu.concatenate %89, %90, %91, %92 in 0 : vector<1x16x8xf32>, vector<1x16x8xf32>, vector<1x16x8xf32>, vector<1x16x8xf32> -> vector<4x16x8xf32>
    %94 = vector.shape_cast %93 : vector<4x16x8xf32> to vector<8x8x8xf32>
    %95 = arith.truncf %74 : vector<8x8x8xf32> to vector<8x8x8xbf16>
    %96 = arith.truncf %84 : vector<8x8x8xf32> to vector<8x8x8xbf16>
    "tpu.trace_start"() <{level = 10 : i32, message = "nqd,nkd->nqk"}> : () -> ()
    %cst_32 = arith.constant dense<0.000000e+00> : vector<8x8x8xf32>
    %97 = tpu.matmul %95, %96, %cst_32 {dimension_numbers = #tpu.dot_dimension_numbers<[2], [2], [1], [1], [0, 0, 0, 1, 1, 1], [0], [0]>} : vector<8x8x8xbf16>, vector<8x8x8xbf16>, vector<8x8x8xf32> -> vector<8x8x8xf32>
    "tpu.trace_stop"() : () -> ()
    %98 = vector.broadcast %22 : vector<1x8x8xf32> to vector<8x8x8xf32>
    %99 = arith.addf %97, %98 : vector<8x8x8xf32>
    %cst_33 = arith.constant dense<0xFF800000> : vector<8x8xf32>
    %100 = vector.multi_reduction <maximumf>, %99, %cst_33 [2] : vector<8x8x8xf32> to vector<8x8xf32>
    %101 = vector.shape_cast %100 : vector<8x8xf32> to vector<8x8x1xf32>
    %102 = vector.broadcast %101 : vector<8x8x1xf32> to vector<8x8x8xf32>
    %103 = arith.subf %99, %102 : vector<8x8x8xf32>
    %104 = math.exp %103 : vector<8x8x8xf32>
    %cst_34 = arith.constant dense<0.000000e+00> : vector<8x8xf32>
    %105 = vector.multi_reduction <add>, %104, %cst_34 [2] : vector<8x8x8xf32> to vector<8x8xf32>
    %106 = vector.shape_cast %105 : vector<8x8xf32> to vector<8x8x1xf32>
    %107 = tpu.reciprocal %106 {approx = true} : vector<8x8x1xf32> -> vector<8x8x1xf32>
    %108 = vector.broadcast %107 : vector<8x8x1xf32> to vector<8x8x8xf32>
    %109 = arith.mulf %104, %108 : vector<8x8x8xf32>
    %110 = arith.truncf %109 : vector<8x8x8xf32> to vector<8x8x8xbf16>
    %111 = arith.truncf %94 : vector<8x8x8xf32> to vector<8x8x8xbf16>
    "tpu.trace_start"() <{level = 10 : i32, message = "nqk,nkd->nqd"}> : () -> ()
    %cst_35 = arith.constant dense<0.000000e+00> : vector<8x8x8xf32>
    %112 = tpu.matmul %110, %111, %cst_35 {dimension_numbers = #tpu.dot_dimension_numbers<[2], [1], [1], [2], [0, 0, 0, 1, 1, 2], [0], [0]>} : vector<8x8x8xbf16>, vector<8x8x8xbf16>, vector<8x8x8xf32> -> vector<8x8x8xf32>
    "tpu.trace_stop"() : () -> ()
    %113 = vector.shape_cast %112 : vector<8x8x8xf32> to vector<4x16x8xf32>
    %114 = vector.extract_strided_slice %113 {offsets = [0, 0, 0], sizes = [1, 16, 8], strides = [1, 1, 1]} : vector<4x16x8xf32> to vector<1x16x8xf32>
    %115 = vector.shape_cast %114 : vector<1x16x8xf32> to vector<16x8xf32>
    %116 = vector.extract_strided_slice %113 {offsets = [1, 0, 0], sizes = [1, 16, 8], strides = [1, 1, 1]} : vector<4x16x8xf32> to vector<1x16x8xf32>
    %117 = vector.shape_cast %116 : vector<1x16x8xf32> to vector<16x8xf32>
    %118 = vector.extract_strided_slice %113 {offsets = [2, 0, 0], sizes = [1, 16, 8], strides = [1, 1, 1]} : vector<4x16x8xf32> to vector<1x16x8xf32>
    %119 = vector.shape_cast %118 : vector<1x16x8xf32> to vector<16x8xf32>
    %120 = vector.extract_strided_slice %113 {offsets = [3, 0, 0], sizes = [1, 16, 8], strides = [1, 1, 1]} : vector<4x16x8xf32> to vector<1x16x8xf32>
    %121 = vector.shape_cast %120 : vector<1x16x8xf32> to vector<16x8xf32>
    %122 = tpu.concatenate %115, %117, %119, %121 in 1 : vector<16x8xf32>, vector<16x8xf32>, vector<16x8xf32>, vector<16x8xf32> -> vector<16x32xf32>
    %123 = arith.truncf %122 : vector<16x32xf32> to vector<16x32xbf16>
    %cst_36 = arith.constant dense<0.000000e+00> : vector<16x32xf32>
    %124 = tpu.matmul %123, %26, %cst_36 {dimension_numbers = #tpu.dot_dimension_numbers<[1], [0], [0], [1], [0, 0, 1, 1], [], []>} : vector<16x32xbf16>, vector<32x32xbf16>, vector<16x32xf32> -> vector<16x32xf32>
    %125 = arith.addf %15, %124 : vector<16x32xf32>
    %126 = vector.broadcast %37 : vector<1x32xf32> to vector<16x32xf32>
    %127 = arith.addf %125, %126 : vector<16x32xf32>
    %cst_37 = arith.constant dense<0.000000e+00> : vector<16xf32>
    %128 = vector.multi_reduction <add>, %127, %cst_37 [1] : vector<16x32xf32> to vector<16xf32>
    %129 = vector.shape_cast %128 : vector<16xf32> to vector<16x1xf32>
    %cst_38 = arith.constant 3.200000e+01 : f32
    %130 = vector.broadcast %cst_38 : f32 to vector<16x1xf32>
    %131 = arith.divf %129, %130 : vector<16x1xf32>
    %132 = arith.mulf %127, %127 : vector<16x32xf32>
    %cst_39 = arith.constant dense<0.000000e+00> : vector<16xf32>
    %133 = vector.multi_reduction <add>, %132, %cst_39 [1] : vector<16x32xf32> to vector<16xf32>
    %134 = vector.shape_cast %133 : vector<16xf32> to vector<16x1xf32>
    %cst_40 = arith.constant 3.200000e+01 : f32
    %135 = vector.broadcast %cst_40 : f32 to vector<16x1xf32>
    %136 = arith.divf %134, %135 : vector<16x1xf32>
    %137 = arith.mulf %131, %131 : vector<16x1xf32>
    %138 = arith.subf %136, %137 : vector<16x1xf32>
    %139 = vector.broadcast %131 : vector<16x1xf32> to vector<16x32xf32>
    %140 = arith.subf %127, %139 : vector<16x32xf32>
    %cst_41 = arith.constant 9.99999974E-6 : f32
    %141 = vector.broadcast %cst_41 : f32 to vector<16x1xf32>
    %142 = arith.addf %138, %141 : vector<16x1xf32>
    %143 = math.rsqrt %142 : vector<16x1xf32>
    %144 = vector.broadcast %143 : vector<16x1xf32> to vector<16x32xf32>
    %145 = arith.mulf %140, %144 : vector<16x32xf32>
    %146 = vector.broadcast %35 : vector<1x32xf32> to vector<16x32xf32>
    %147 = arith.mulf %145, %146 : vector<16x32xf32>
    %148 = vector.broadcast %36 : vector<1x32xf32> to vector<16x32xf32>
    %149 = arith.addf %147, %148 : vector<16x32xf32>
    %150 = arith.truncf %149 : vector<16x32xf32> to vector<16x32xbf16>
    %cst_42 = arith.constant dense<0.000000e+00> : vector<16x128xf32>
    %151 = tpu.matmul %150, %28, %cst_42 {dimension_numbers = #tpu.dot_dimension_numbers<[1], [0], [0], [1], [0, 0, 1, 1], [], []>} : vector<16x32xbf16>, vector<32x128xbf16>, vector<16x128xf32> -> vector<16x128xf32>
    %152 = vector.broadcast %40 : vector<1x128xf32> to vector<16x128xf32>
    %153 = arith.addf %151, %152 : vector<16x128xf32>
    %cst_43 = arith.constant 0.000000e+00 : f32
    %154 = vector.broadcast %cst_43 : f32 to vector<16x128xf32>
    %155 = arith.maximumf %153, %154 : vector<16x128xf32>
    %156 = arith.truncf %155 : vector<16x128xf32> to vector<16x128xbf16>
    %cst_44 = arith.constant dense<0.000000e+00> : vector<16x32xf32>
    %157 = tpu.matmul %156, %30, %cst_44 {dimension_numbers = #tpu.dot_dimension_numbers<[1], [0], [0], [1], [0, 0, 1, 1], [], []>} : vector<16x128xbf16>, vector<128x32xbf16>, vector<16x32xf32> -> vector<16x32xf32>
    %158 = arith.addf %127, %157 : vector<16x32xf32>
    %159 = vector.broadcast %38 : vector<1x32xf32> to vector<16x32xf32>
    %160 = arith.addf %158, %159 : vector<16x32xf32>
    %c1 = arith.constant 1 : index
    %c0_45 = arith.constant 0 : index
    %c0_46 = arith.constant 0 : index
    %161 = vector.load %arg4[%c1, %c0_45, %c0_46] : memref<2x32x96xbf16, #tpu.memory_space<vmem>>, vector<1x32x96xbf16>
    %162 = vector.shape_cast %161 : vector<1x32x96xbf16> to vector<32x96xbf16>
    %c1_47 = arith.constant 1 : index
    %c0_48 = arith.constant 0 : index
    %c0_49 = arith.constant 0 : index
    %163 = vector.load %arg5[%c1_47, %c0_48, %c0_49] : memref<2x32x32xbf16, #tpu.memory_space<vmem>>, vector<1x32x32xbf16>
    %164 = vector.shape_cast %163 : vector<1x32x32xbf16> to vector<32x32xbf16>
    %c1_50 = arith.constant 1 : index
    %c0_51 = arith.constant 0 : index
    %c0_52 = arith.constant 0 : index
    %165 = vector.load %arg6[%c1_50, %c0_51, %c0_52] : memref<2x32x128xbf16, #tpu.memory_space<vmem>>, vector<1x32x128xbf16>
    %166 = vector.shape_cast %165 : vector<1x32x128xbf16> to vector<32x128xbf16>
    %c1_53 = arith.constant 1 : index
    %c0_54 = arith.constant 0 : index
    %c0_55 = arith.constant 0 : index
    %167 = vector.load %arg7[%c1_53, %c0_54, %c0_55] : memref<2x128x32xbf16, #tpu.memory_space<vmem>>, vector<1x128x32xbf16>
    %168 = vector.shape_cast %167 : vector<1x128x32xbf16> to vector<128x32xbf16>
    %c1_56 = arith.constant 1 : index
    %c0_57 = arith.constant 0 : index
    %c0_58 = arith.constant 0 : index
    %169 = vector.load %arg8[%c1_56, %c0_57, %c0_58] : memref<2x6x32xf32, #tpu.memory_space<vmem>>, vector<1x6x32xf32>
    %170 = vector.shape_cast %169 : vector<1x6x32xf32> to vector<6x32xf32>
    %171 = vector.extract_strided_slice %170 {offsets = [0, 0], sizes = [1, 32], strides = [1, 1]} : vector<6x32xf32> to vector<1x32xf32>
    %172 = vector.extract_strided_slice %170 {offsets = [1, 0], sizes = [1, 32], strides = [1, 1]} : vector<6x32xf32> to vector<1x32xf32>
    %173 = vector.extract_strided_slice %170 {offsets = [2, 0], sizes = [1, 32], strides = [1, 1]} : vector<6x32xf32> to vector<1x32xf32>
    %174 = vector.extract_strided_slice %170 {offsets = [3, 0], sizes = [1, 32], strides = [1, 1]} : vector<6x32xf32> to vector<1x32xf32>
    %175 = vector.extract_strided_slice %170 {offsets = [4, 0], sizes = [1, 32], strides = [1, 1]} : vector<6x32xf32> to vector<1x32xf32>
    %176 = vector.extract_strided_slice %170 {offsets = [5, 0], sizes = [1, 32], strides = [1, 1]} : vector<6x32xf32> to vector<1x32xf32>
    %c1_59 = arith.constant 1 : index
    %c0_60 = arith.constant 0 : index
    %c0_61 = arith.constant 0 : index
    %177 = vector.load %arg9[%c1_59, %c0_60, %c0_61] : memref<2x1x128xf32, #tpu.memory_space<vmem>>, vector<1x1x128xf32>
    %178 = vector.shape_cast %177 : vector<1x1x128xf32> to vector<1x128xf32>
    %cst_62 = arith.constant dense<0.000000e+00> : vector<16xf32>
    %179 = vector.multi_reduction <add>, %160, %cst_62 [1] : vector<16x32xf32> to vector<16xf32>
    %180 = vector.shape_cast %179 : vector<16xf32> to vector<16x1xf32>
    %cst_63 = arith.constant 3.200000e+01 : f32
    %181 = vector.broadcast %cst_63 : f32 to vector<16x1xf32>
    %182 = arith.divf %180, %181 : vector<16x1xf32>
    %183 = arith.mulf %160, %160 : vector<16x32xf32>
    %cst_64 = arith.constant dense<0.000000e+00> : vector<16xf32>
    %184 = vector.multi_reduction <add>, %183, %cst_64 [1] : vector<16x32xf32> to vector<16xf32>
    %185 = vector.shape_cast %184 : vector<16xf32> to vector<16x1xf32>
    %cst_65 = arith.constant 3.200000e+01 : f32
    %186 = vector.broadcast %cst_65 : f32 to vector<16x1xf32>
    %187 = arith.divf %185, %186 : vector<16x1xf32>
    %188 = arith.mulf %182, %182 : vector<16x1xf32>
    %189 = arith.subf %187, %188 : vector<16x1xf32>
    %190 = vector.broadcast %182 : vector<16x1xf32> to vector<16x32xf32>
    %191 = arith.subf %160, %190 : vector<16x32xf32>
    %cst_66 = arith.constant 9.99999974E-6 : f32
    %192 = vector.broadcast %cst_66 : f32 to vector<16x1xf32>
    %193 = arith.addf %189, %192 : vector<16x1xf32>
    %194 = math.rsqrt %193 : vector<16x1xf32>
    %195 = vector.broadcast %194 : vector<16x1xf32> to vector<16x32xf32>
    %196 = arith.mulf %191, %195 : vector<16x32xf32>
    %197 = vector.broadcast %171 : vector<1x32xf32> to vector<16x32xf32>
    %198 = arith.mulf %196, %197 : vector<16x32xf32>
    %199 = vector.broadcast %172 : vector<1x32xf32> to vector<16x32xf32>
    %200 = arith.addf %198, %199 : vector<16x32xf32>
    %201 = arith.truncf %200 : vector<16x32xf32> to vector<16x32xbf16>
    %cst_67 = arith.constant dense<0.000000e+00> : vector<16x96xf32>
    %202 = tpu.matmul %201, %162, %cst_67 {dimension_numbers = #tpu.dot_dimension_numbers<[1], [0], [0], [1], [0, 0, 1, 1], [], []>} : vector<16x32xbf16>, vector<32x96xbf16>, vector<16x96xf32> -> vector<16x96xf32>
    %203 = vector.extract_strided_slice %202 {offsets = [0, 0], sizes = [16, 8], strides = [1, 1]} : vector<16x96xf32> to vector<16x8xf32>
    %204 = vector.extract_strided_slice %202 {offsets = [0, 8], sizes = [16, 8], strides = [1, 1]} : vector<16x96xf32> to vector<16x8xf32>
    %205 = vector.extract_strided_slice %202 {offsets = [0, 16], sizes = [16, 8], strides = [1, 1]} : vector<16x96xf32> to vector<16x8xf32>
    %206 = vector.extract_strided_slice %202 {offsets = [0, 24], sizes = [16, 8], strides = [1, 1]} : vector<16x96xf32> to vector<16x8xf32>
    %207 = vector.shape_cast %203 : vector<16x8xf32> to vector<1x16x8xf32>
    %208 = vector.shape_cast %204 : vector<16x8xf32> to vector<1x16x8xf32>
    %209 = vector.shape_cast %205 : vector<16x8xf32> to vector<1x16x8xf32>
    %210 = vector.shape_cast %206 : vector<16x8xf32> to vector<1x16x8xf32>
    %211 = tpu.concatenate %207, %208, %209, %210 in 0 : vector<1x16x8xf32>, vector<1x16x8xf32>, vector<1x16x8xf32>, vector<1x16x8xf32> -> vector<4x16x8xf32>
    %212 = vector.shape_cast %211 : vector<4x16x8xf32> to vector<8x8x8xf32>
    %213 = vector.extract_strided_slice %202 {offsets = [0, 32], sizes = [16, 8], strides = [1, 1]} : vector<16x96xf32> to vector<16x8xf32>
    %214 = vector.extract_strided_slice %202 {offsets = [0, 40], sizes = [16, 8], strides = [1, 1]} : vector<16x96xf32> to vector<16x8xf32>
    %215 = vector.extract_strided_slice %202 {offsets = [0, 48], sizes = [16, 8], strides = [1, 1]} : vector<16x96xf32> to vector<16x8xf32>
    %216 = vector.extract_strided_slice %202 {offsets = [0, 56], sizes = [16, 8], strides = [1, 1]} : vector<16x96xf32> to vector<16x8xf32>
    %217 = vector.shape_cast %213 : vector<16x8xf32> to vector<1x16x8xf32>
    %218 = vector.shape_cast %214 : vector<16x8xf32> to vector<1x16x8xf32>
    %219 = vector.shape_cast %215 : vector<16x8xf32> to vector<1x16x8xf32>
    %220 = vector.shape_cast %216 : vector<16x8xf32> to vector<1x16x8xf32>
    %221 = tpu.concatenate %217, %218, %219, %220 in 0 : vector<1x16x8xf32>, vector<1x16x8xf32>, vector<1x16x8xf32>, vector<1x16x8xf32> -> vector<4x16x8xf32>
    %222 = vector.shape_cast %221 : vector<4x16x8xf32> to vector<8x8x8xf32>
    %223 = vector.extract_strided_slice %202 {offsets = [0, 64], sizes = [16, 8], strides = [1, 1]} : vector<16x96xf32> to vector<16x8xf32>
    %224 = vector.extract_strided_slice %202 {offsets = [0, 72], sizes = [16, 8], strides = [1, 1]} : vector<16x96xf32> to vector<16x8xf32>
    %225 = vector.extract_strided_slice %202 {offsets = [0, 80], sizes = [16, 8], strides = [1, 1]} : vector<16x96xf32> to vector<16x8xf32>
    %226 = vector.extract_strided_slice %202 {offsets = [0, 88], sizes = [16, 8], strides = [1, 1]} : vector<16x96xf32> to vector<16x8xf32>
    %227 = vector.shape_cast %223 : vector<16x8xf32> to vector<1x16x8xf32>
    %228 = vector.shape_cast %224 : vector<16x8xf32> to vector<1x16x8xf32>
    %229 = vector.shape_cast %225 : vector<16x8xf32> to vector<1x16x8xf32>
    %230 = vector.shape_cast %226 : vector<16x8xf32> to vector<1x16x8xf32>
    %231 = tpu.concatenate %227, %228, %229, %230 in 0 : vector<1x16x8xf32>, vector<1x16x8xf32>, vector<1x16x8xf32>, vector<1x16x8xf32> -> vector<4x16x8xf32>
    %232 = vector.shape_cast %231 : vector<4x16x8xf32> to vector<8x8x8xf32>
    %233 = arith.truncf %212 : vector<8x8x8xf32> to vector<8x8x8xbf16>
    %234 = arith.truncf %222 : vector<8x8x8xf32> to vector<8x8x8xbf16>
    "tpu.trace_start"() <{level = 10 : i32, message = "nqd,nkd->nqk"}> : () -> ()
    %cst_68 = arith.constant dense<0.000000e+00> : vector<8x8x8xf32>
    %235 = tpu.matmul %233, %234, %cst_68 {dimension_numbers = #tpu.dot_dimension_numbers<[2], [2], [1], [1], [0, 0, 0, 1, 1, 1], [0], [0]>} : vector<8x8x8xbf16>, vector<8x8x8xbf16>, vector<8x8x8xf32> -> vector<8x8x8xf32>
    "tpu.trace_stop"() : () -> ()
    %236 = vector.broadcast %22 : vector<1x8x8xf32> to vector<8x8x8xf32>
    %237 = arith.addf %235, %236 : vector<8x8x8xf32>
    %cst_69 = arith.constant dense<0xFF800000> : vector<8x8xf32>
    %238 = vector.multi_reduction <maximumf>, %237, %cst_69 [2] : vector<8x8x8xf32> to vector<8x8xf32>
    %239 = vector.shape_cast %238 : vector<8x8xf32> to vector<8x8x1xf32>
    %240 = vector.broadcast %239 : vector<8x8x1xf32> to vector<8x8x8xf32>
    %241 = arith.subf %237, %240 : vector<8x8x8xf32>
    %242 = math.exp %241 : vector<8x8x8xf32>
    %cst_70 = arith.constant dense<0.000000e+00> : vector<8x8xf32>
    %243 = vector.multi_reduction <add>, %242, %cst_70 [2] : vector<8x8x8xf32> to vector<8x8xf32>
    %244 = vector.shape_cast %243 : vector<8x8xf32> to vector<8x8x1xf32>
    %245 = tpu.reciprocal %244 {approx = true} : vector<8x8x1xf32> -> vector<8x8x1xf32>
    %246 = vector.broadcast %245 : vector<8x8x1xf32> to vector<8x8x8xf32>
    %247 = arith.mulf %242, %246 : vector<8x8x8xf32>
    %248 = arith.truncf %247 : vector<8x8x8xf32> to vector<8x8x8xbf16>
    %249 = arith.truncf %232 : vector<8x8x8xf32> to vector<8x8x8xbf16>
    "tpu.trace_start"() <{level = 10 : i32, message = "nqk,nkd->nqd"}> : () -> ()
    %cst_71 = arith.constant dense<0.000000e+00> : vector<8x8x8xf32>
    %250 = tpu.matmul %248, %249, %cst_71 {dimension_numbers = #tpu.dot_dimension_numbers<[2], [1], [1], [2], [0, 0, 0, 1, 1, 2], [0], [0]>} : vector<8x8x8xbf16>, vector<8x8x8xbf16>, vector<8x8x8xf32> -> vector<8x8x8xf32>
    "tpu.trace_stop"() : () -> ()
    %251 = vector.shape_cast %250 : vector<8x8x8xf32> to vector<4x16x8xf32>
    %252 = vector.extract_strided_slice %251 {offsets = [0, 0, 0], sizes = [1, 16, 8], strides = [1, 1, 1]} : vector<4x16x8xf32> to vector<1x16x8xf32>
    %253 = vector.shape_cast %252 : vector<1x16x8xf32> to vector<16x8xf32>
    %254 = vector.extract_strided_slice %251 {offsets = [1, 0, 0], sizes = [1, 16, 8], strides = [1, 1, 1]} : vector<4x16x8xf32> to vector<1x16x8xf32>
    %255 = vector.shape_cast %254 : vector<1x16x8xf32> to vector<16x8xf32>
    %256 = vector.extract_strided_slice %251 {offsets = [2, 0, 0], sizes = [1, 16, 8], strides = [1, 1, 1]} : vector<4x16x8xf32> to vector<1x16x8xf32>
    %257 = vector.shape_cast %256 : vector<1x16x8xf32> to vector<16x8xf32>
    %258 = vector.extract_strided_slice %251 {offsets = [3, 0, 0], sizes = [1, 16, 8], strides = [1, 1, 1]} : vector<4x16x8xf32> to vector<1x16x8xf32>
    %259 = vector.shape_cast %258 : vector<1x16x8xf32> to vector<16x8xf32>
    %260 = tpu.concatenate %253, %255, %257, %259 in 1 : vector<16x8xf32>, vector<16x8xf32>, vector<16x8xf32>, vector<16x8xf32> -> vector<16x32xf32>
    %261 = arith.truncf %260 : vector<16x32xf32> to vector<16x32xbf16>
    %cst_72 = arith.constant dense<0.000000e+00> : vector<16x32xf32>
    %262 = tpu.matmul %261, %164, %cst_72 {dimension_numbers = #tpu.dot_dimension_numbers<[1], [0], [0], [1], [0, 0, 1, 1], [], []>} : vector<16x32xbf16>, vector<32x32xbf16>, vector<16x32xf32> -> vector<16x32xf32>
    %263 = arith.addf %160, %262 : vector<16x32xf32>
    %264 = vector.broadcast %175 : vector<1x32xf32> to vector<16x32xf32>
    %265 = arith.addf %263, %264 : vector<16x32xf32>
    %cst_73 = arith.constant dense<0.000000e+00> : vector<16xf32>
    %266 = vector.multi_reduction <add>, %265, %cst_73 [1] : vector<16x32xf32> to vector<16xf32>
    %267 = vector.shape_cast %266 : vector<16xf32> to vector<16x1xf32>
    %cst_74 = arith.constant 3.200000e+01 : f32
    %268 = vector.broadcast %cst_74 : f32 to vector<16x1xf32>
    %269 = arith.divf %267, %268 : vector<16x1xf32>
    %270 = arith.mulf %265, %265 : vector<16x32xf32>
    %cst_75 = arith.constant dense<0.000000e+00> : vector<16xf32>
    %271 = vector.multi_reduction <add>, %270, %cst_75 [1] : vector<16x32xf32> to vector<16xf32>
    %272 = vector.shape_cast %271 : vector<16xf32> to vector<16x1xf32>
    %cst_76 = arith.constant 3.200000e+01 : f32
    %273 = vector.broadcast %cst_76 : f32 to vector<16x1xf32>
    %274 = arith.divf %272, %273 : vector<16x1xf32>
    %275 = arith.mulf %269, %269 : vector<16x1xf32>
    %276 = arith.subf %274, %275 : vector<16x1xf32>
    %277 = vector.broadcast %269 : vector<16x1xf32> to vector<16x32xf32>
    %278 = arith.subf %265, %277 : vector<16x32xf32>
    %cst_77 = arith.constant 9.99999974E-6 : f32
    %279 = vector.broadcast %cst_77 : f32 to vector<16x1xf32>
    %280 = arith.addf %276, %279 : vector<16x1xf32>
    %281 = math.rsqrt %280 : vector<16x1xf32>
    %282 = vector.broadcast %281 : vector<16x1xf32> to vector<16x32xf32>
    %283 = arith.mulf %278, %282 : vector<16x32xf32>
    %284 = vector.broadcast %173 : vector<1x32xf32> to vector<16x32xf32>
    %285 = arith.mulf %283, %284 : vector<16x32xf32>
    %286 = vector.broadcast %174 : vector<1x32xf32> to vector<16x32xf32>
    %287 = arith.addf %285, %286 : vector<16x32xf32>
    %288 = arith.truncf %287 : vector<16x32xf32> to vector<16x32xbf16>
    %cst_78 = arith.constant dense<0.000000e+00> : vector<16x128xf32>
    %289 = tpu.matmul %288, %166, %cst_78 {dimension_numbers = #tpu.dot_dimension_numbers<[1], [0], [0], [1], [0, 0, 1, 1], [], []>} : vector<16x32xbf16>, vector<32x128xbf16>, vector<16x128xf32> -> vector<16x128xf32>
    %290 = vector.broadcast %178 : vector<1x128xf32> to vector<16x128xf32>
    %291 = arith.addf %289, %290 : vector<16x128xf32>
    %cst_79 = arith.constant 0.000000e+00 : f32
    %292 = vector.broadcast %cst_79 : f32 to vector<16x128xf32>
    %293 = arith.maximumf %291, %292 : vector<16x128xf32>
    %294 = arith.truncf %293 : vector<16x128xf32> to vector<16x128xbf16>
    %cst_80 = arith.constant dense<0.000000e+00> : vector<16x32xf32>
    %295 = tpu.matmul %294, %168, %cst_80 {dimension_numbers = #tpu.dot_dimension_numbers<[1], [0], [0], [1], [0, 0, 1, 1], [], []>} : vector<16x128xbf16>, vector<128x32xbf16>, vector<16x32xf32> -> vector<16x32xf32>
    %296 = arith.addf %265, %295 : vector<16x32xf32>
    %297 = vector.broadcast %176 : vector<1x32xf32> to vector<16x32xf32>
    %298 = arith.addf %296, %297 : vector<16x32xf32>
    %c0_81 = arith.constant 0 : index
    %c0_82 = arith.constant 0 : index
    %299 = vector.load %arg10[%c0_81, %c0_82] : memref<2x32xf32, #tpu.memory_space<vmem>>, vector<2x32xf32>
    %300 = vector.extract_strided_slice %299 {offsets = [0, 0], sizes = [1, 32], strides = [1, 1]} : vector<2x32xf32> to vector<1x32xf32>
    %301 = vector.extract_strided_slice %299 {offsets = [1, 0], sizes = [1, 32], strides = [1, 1]} : vector<2x32xf32> to vector<1x32xf32>
    %cst_83 = arith.constant dense<0.000000e+00> : vector<16xf32>
    %302 = vector.multi_reduction <add>, %298, %cst_83 [1] : vector<16x32xf32> to vector<16xf32>
    %303 = vector.shape_cast %302 : vector<16xf32> to vector<16x1xf32>
    %cst_84 = arith.constant 3.200000e+01 : f32
    %304 = vector.broadcast %cst_84 : f32 to vector<16x1xf32>
    %305 = arith.divf %303, %304 : vector<16x1xf32>
    %306 = arith.mulf %298, %298 : vector<16x32xf32>
    %cst_85 = arith.constant dense<0.000000e+00> : vector<16xf32>
    %307 = vector.multi_reduction <add>, %306, %cst_85 [1] : vector<16x32xf32> to vector<16xf32>
    %308 = vector.shape_cast %307 : vector<16xf32> to vector<16x1xf32>
    %cst_86 = arith.constant 3.200000e+01 : f32
    %309 = vector.broadcast %cst_86 : f32 to vector<16x1xf32>
    %310 = arith.divf %308, %309 : vector<16x1xf32>
    %311 = arith.mulf %305, %305 : vector<16x1xf32>
    %312 = arith.subf %310, %311 : vector<16x1xf32>
    %313 = vector.broadcast %305 : vector<16x1xf32> to vector<16x32xf32>
    %314 = arith.subf %298, %313 : vector<16x32xf32>
    %cst_87 = arith.constant 9.99999974E-6 : f32
    %315 = vector.broadcast %cst_87 : f32 to vector<16x1xf32>
    %316 = arith.addf %312, %315 : vector<16x1xf32>
    %317 = math.rsqrt %316 : vector<16x1xf32>
    %318 = vector.broadcast %317 : vector<16x1xf32> to vector<16x32xf32>
    %319 = arith.mulf %314, %318 : vector<16x32xf32>
    %320 = vector.broadcast %300 : vector<1x32xf32> to vector<16x32xf32>
    %321 = arith.mulf %319, %320 : vector<16x32xf32>
    %322 = vector.broadcast %301 : vector<1x32xf32> to vector<16x32xf32>
    %323 = arith.addf %321, %322 : vector<16x32xf32>
    %324 = arith.truncf %323 : vector<16x32xf32> to vector<16x32xbf16>
    %c0_88 = arith.constant 0 : index
    %c0_89 = arith.constant 0 : index
    %325 = vector.load %arg11[%c0_88, %c0_89] : memref<32x128xbf16, #tpu.memory_space<vmem>>, vector<32x128xbf16>
    %cst_90 = arith.constant dense<0.000000e+00> : vector<16x128xf32>
    %326 = tpu.matmul %324, %325, %cst_90 {dimension_numbers = #tpu.dot_dimension_numbers<[1], [0], [0], [1], [0, 0, 1, 1], [], []>} : vector<16x32xbf16>, vector<32x128xbf16>, vector<16x128xf32> -> vector<16x128xf32>
    %c0_91 = arith.constant 0 : index
    %c0_92 = arith.constant 0 : index
    %327 = vector.load %arg12[%c0_91, %c0_92] : memref<1x128xf32, #tpu.memory_space<vmem>>, vector<1x128xf32>
    %328 = vector.broadcast %327 : vector<1x128xf32> to vector<16x128xf32>
    %329 = arith.addf %326, %328 : vector<16x128xf32>
    %330 = vector.shape_cast %329 : vector<16x128xf32> to vector<2x8x128xf32>
    %c0_93 = arith.constant 0 : index
    %c0_94 = arith.constant 0 : index
    %c0_95 = arith.constant 0 : index
    %331 = vector.load %arg13[%c0_93, %c0_94, %c0_95] : memref<2x8x128xf32, #tpu.memory_space<vmem>>, vector<2x8x128xf32>
    tpu.vector_store %arg13[%c0_93, %c0_94, %c0_95], %330 {strides = array<i32>} : memref<2x8x128xf32, #tpu.memory_space<vmem>>, vector<2x8x128xf32>,
    return
  }
  func.func @transform_0(%arg0: i32) -> (i32, i32, i32) {
    %c0_i32 = arith.constant 0 : i32
    %c0_i32_0 = arith.constant 0 : i32
    %c0_i32_1 = arith.constant 0 : i32
    return %arg0, %c0_i32, %c0_i32_0 : i32, i32, i32
  }
  func.func @transform_1(%arg0: i32) -> (i32, i32) {
    %c0_i32 = arith.constant 0 : i32
    %c0_i32_0 = arith.constant 0 : i32
    %c0_i32_1 = arith.constant 0 : i32
    return %c0_i32, %c0_i32_0 : i32, i32
  }
  func.func @transform_2(%arg0: i32) -> (i32, i32) {
    %c0_i32 = arith.constant 0 : i32
    %c0_i32_0 = arith.constant 0 : i32
    %c0_i32_1 = arith.constant 0 : i32
    return %c0_i32, %c0_i32_0 : i32, i32
  }
  func.func @transform_3(%arg0: i32) -> (i32, i32, i32) {
    %c0_i32 = arith.constant 0 : i32
    %c0_i32_0 = arith.constant 0 : i32
    %c0_i32_1 = arith.constant 0 : i32
    %c0_i32_2 = arith.constant 0 : i32
    return %c0_i32, %c0_i32_0, %c0_i32_1 : i32, i32, i32
  }
  func.func @transform_4(%arg0: i32) -> (i32, i32, i32) {
    %c0_i32 = arith.constant 0 : i32
    %c0_i32_0 = arith.constant 0 : i32
    %c0_i32_1 = arith.constant 0 : i32
    %c0_i32_2 = arith.constant 0 : i32
    return %c0_i32, %c0_i32_0, %c0_i32_1 : i32, i32, i32
  }
  func.func @transform_5(%arg0: i32) -> (i32, i32, i32) {
    %c0_i32 = arith.constant 0 : i32
    %c0_i32_0 = arith.constant 0 : i32
    %c0_i32_1 = arith.constant 0 : i32
    %c0_i32_2 = arith.constant 0 : i32
    return %c0_i32, %c0_i32_0, %c0_i32_1 : i32, i32, i32
  }
  func.func @transform_6(%arg0: i32) -> (i32, i32, i32) {
    %c0_i32 = arith.constant 0 : i32
    %c0_i32_0 = arith.constant 0 : i32
    %c0_i32_1 = arith.constant 0 : i32
    %c0_i32_2 = arith.constant 0 : i32
    return %c0_i32, %c0_i32_0, %c0_i32_1 : i32, i32, i32
  }
  func.func @transform_7(%arg0: i32) -> (i32, i32, i32) {
    %c0_i32 = arith.constant 0 : i32
    %c0_i32_0 = arith.constant 0 : i32
    %c0_i32_1 = arith.constant 0 : i32
    %c0_i32_2 = arith.constant 0 : i32
    return %c0_i32, %c0_i32_0, %c0_i32_1 : i32, i32, i32
  }
  func.func @transform_8(%arg0: i32) -> (i32, i32, i32) {
    %c0_i32 = arith.constant 0 : i32
    %c0_i32_0 = arith.constant 0 : i32
    %c0_i32_1 = arith.constant 0 : i32
    %c0_i32_2 = arith.constant 0 : i32
    return %c0_i32, %c0_i32_0, %c0_i32_1 : i32, i32, i32
  }
  func.func @transform_9(%arg0: i32) -> (i32, i32) {
    %c0_i32 = arith.constant 0 : i32
    %c0_i32_0 = arith.constant 0 : i32
    %c0_i32_1 = arith.constant 0 : i32
    return %c0_i32, %c0_i32_0 : i32, i32
  }
  func.func @transform_10(%arg0: i32) -> (i32, i32) {
    %c0_i32 = arith.constant 0 : i32
    %c0_i32_0 = arith.constant 0 : i32
    %c0_i32_1 = arith.constant 0 : i32
    return %c0_i32, %c0_i32_0 : i32, i32
  }
  func.func @transform_11(%arg0: i32) -> (i32, i32) {
    %c0_i32 = arith.constant 0 : i32
    %c0_i32_0 = arith.constant 0 : i32
    %c0_i32_1 = arith.constant 0 : i32
    return %c0_i32, %c0_i32_0 : i32, i32
  }
  func.func @transform_12(%arg0: i32) -> (i32, i32, i32) {
    %c0_i32 = arith.constant 0 : i32
    %c0_i32_0 = arith.constant 0 : i32
    %c0_i32_1 = arith.constant 0 : i32
    return %arg0, %c0_i32, %c0_i32_0 : i32, i32, i32
  }
}

</mosaic_0001>

<bundles_post_ra>
// kernel: tpu_custom_call.1
= control target key start
LH: loop header
LB: loop body
LE: loop exit
PB: predicated region body
PF: predicated region fallthrough
CT: control target
= control target key end

     0   :  { %v3675_v1 = vmov 0   ;;  %v3676_v2 = vmov 0.0   ;;  %vm3677_vm0 = vmmov 0   ;;  %s4464_s0 = inlined_call_operand.vmem [shape: s32[2,8,1], index: 0, kind: input, shape index: {}]   ;;  %s4465_s1 = inlined_call_operand.vmem [shape: bf16[64,32], index: 1, kind: input, shape index: {}]   ;;  %s4466_s2 = inlined_call_operand.vmem [shape: f32[8,32], index: 2, kind: input, shape index: {}]   ;;  %s4467_s3 = inlined_call_operand.vmem [shape: bf16[2,32,96], index: 3, kind: input, shape index: {}]   ;;  %s4468_s4 = inlined_call_operand.vmem [shape: bf16[2,32,32], index: 4, kind: input, shape index: {}]   ;;  %s4469_s5 = inlined_call_operand.vmem [shape: bf16[2,32,128], index: 5, kind: input, shape index: {}]   ;;  %s4470_s6 = inlined_call_operand.vmem [shape: bf16[2,128,32], index: 6, kind: input, shape index: {}]   ;;  %s4471_s7 = inlined_call_operand.vmem [shape: f32[2,6,32], index: 7, kind: input, shape index: {}]   ;;  %s4472_s8 = inlined_call_operand.vmem [shape: f32[2,1,128], index: 8, kind: input, shape index: {}]   ;;  %s4473_s9 = inlined_call_operand.vmem [shape: f32[2,32], index: 9, kind: input, shape index: {}]   ;;  %s4474_s10 = inlined_call_operand.vmem [shape: bf16[32,128], index: 10, kind: input, shape index: {}]   ;;  %s4475_s11 = inlined_call_operand.vmem [shape: f32[1,128], index: 11, kind: input, shape index: {}]   ;;  %s4476_s12 = inlined_call_operand.hbm [shape: f32[2,8,128], index: 12, kind: output, shape index: {}]  }
   0x1   :  { %v43_v0 = vld [vmem:[%s4464_s0] sm:$0xff]  ;;  %3474 = vset.pattern.permute.xlu0 %v3675_v1  ;;  %3160 = vmatprep.subr.bf16.mxu1 %v3676_v2  ;;  %v3535_v3 = vld [vmem:[%s4465_s1 + $0x18] sm:$0xff]   ;;  %v44_v4 = vld [vmem:[%s4464_s0 + $0x8] sm:$0xff] }
   0x2   :  { %48 = vperm.xlu0 %3474, %v43_v0   ;;  %3186 = vmatprep.subr.bf16.mxu0 %v3676_v2  ;;  %v3536_v5 = vld [vmem:[%s4465_s1 + $0x10] sm:$0xff]   ;;  %v3537_v6 = vld [vmem:[%s4465_s1 + $0x8] sm:$0xff]   ;;  %v3538_v7 = vld [vmem:[%s4465_s1] sm:$0xff]  }
   0x3   :  { %3161 = vmatpush3.bf16.msra.mxu1 %v3535_v3  ;;  %3168 = vmatprep.mubr.msk.bf16.mxu1 %vm3677_vm0, %v3676_v2 }
   0x4   :  { %3162 = vmatprep.subr.bf16.mxu1 %v3676_v2  ;;  %3188 = vmatprep.mubr.msk.bf16.mxu0 %vm3677_vm0, %v3676_v2 }
   0x6   :  { %51 = vperm.xlu0 %3474, %v44_v4  }
   0x7   :  { %3163 = vmatpush3.bf16.msra.mxu1 %v3536_v5 }
   0x8   :  { %3164 = vmatprep.subr.bf16.mxu1 %v3676_v2 }
   0xb   :  { %3165 = vmatpush3.bf16.msra.mxu1 %v3537_v6 }
   0xc   :  { %3166 = vmatprep.subr.bf16.mxu1 %v3676_v2 }
   0xf   :  { %3167 = vmatpush3.bf16.msra.mxu1 %v3538_v7 }
  0x10   :  { %3172 = vmatprep.subr.bf16.mxu1 %v3676_v2 }
  0x11   :  { %17 = vsyncpa [#allocation3], 0  ;;  %v45_v8 = vlaneseq  ;;  %vm92_vm3 = vcmask 523264   ;;  %v137_v15 = vld [vmem:[%s4466_s2] sm:$0xff]  ;;  %vm174_vm4 = vcmask 261120   ;;  %v3539_v28 = vld [vmem:[%s4467_s3 + $0x8] sm:$0xff]  }
  0x12   :  { %v3540_v29 = vld [vmem:[%s4467_s3] sm:$0xff]   ;;  %s3678_s20 = smov 120   ;;  %s3679_s21 = smov 96   ;;  %vm306_vm5 = vcmask 64512   ;;  %vm797_vm6 = vcmask 1043456   ;;  %vm1203_vm8 = vcmask 130048  }
  0x13   :  { %v3782_v9 = vand.u32 127, %v45_v8  ;;  %v3815_v44 = vshrl.u32 %v45_v8, 7  ;;  %v3823_v47 = vld [vmem:[%s4471_s7] sm:$0x3f]  ;;  %s3680_s22 = smov 112   ;;  %s3681_s23 = smov 104  }
  0x14   :  { %s3682_s24 = smov 64   ;;  %s3684_s25 = smov 8   ;;  %vm1206_vm9 = vcmask 195584  }
  0x15   :  { %v3818_v45 = vsub.s32 0, %v3815_v44  ;;  %v3829_v51 = vsub.s32 1, %v3815_v44  ;;  %vm142_vm7 = vcmp.ge.s32.totalorder %v3815_v44, %v3782_v9  ;;  %s3685_s30 = smov 16   ;;  %s3686_s0 = smov 24  }
  0x17   :  { %v209_v50 = vrot.slane %v3823_v47, %v3818_v45  ;;  %v215_v56 = vrot.slane %v3823_v47, %v3829_v51 }
  0x7d   :  { %v49_v10 = vpop.permute.xlu0 %48 }
  0x7e   :  { %vm53_vm1 = vcmp.eq.s32.totalorder %v49_v10, %v3782_v9 }
  0x7f   :  { %v2943_v12 = vsel %vm53_vm1, 1.0, %v3676_v2 }
  0x81   :  { %v52_v11 = vpop.permute.xlu0 %51 }
  0x82   :  { %vm54_vm2 = vcmp.eq.s32.totalorder %v52_v11, %v3782_v9 }
  0x83   :  { %v2944_v13 = vsel %vm54_vm2, 1.0, %v3676_v2 }
  0x84   :  { %v59_v14 = vpack.c.bf16 %v2944_v13, %v2943_v12 }
  0x86   :  { %3169 = vmatmul.mubr.msk.bf16.vlgmr.msra.gmra.mxu1 %vm92_vm3, %v59_v14 }
  0x87   :  { %3176 = vmatprep.mubr.msk.bf16.mxu1 %vm3677_vm0, %v3676_v2  ;;  %3173 = vmatpush3.bf16.msra.mxu1 %v3539_v28 }
  0x88   :  { %3174 = vmatprep.subr.bf16.mxu1 %v3676_v2 }
  0x8b   :  { %3175 = vmatpush3.bf16.msra.mxu1 %v3540_v29 }
  0x8c   :  { %3180 = vmatprep.subr.bf16.mxu1 %v3676_v2 }
 0x146   :  { %v130_v16 = vpop.f32.mrf.mxu1 }
 0x147   :  { %v3793_v17 = vadd.f32 %v137_v15, %v130_v16 }
 0x148   :  { %v3170_v18 = vpop.f32.mrf.mxu1 }
 0x149   :  { %v175_v19 = vsel %vm174_vm4, %v3793_v17, 0.0  ;;  %v184_v20 = vmul.f32 %v3793_v17, %v3793_v17 }
 0x14a   :  { %176 = vadd.xlane.f32.xlu1 %v175_v19  ;;  %v133_v21 = vpop.f32.mrf.mxu1 }
 0x14b   :  { %v3799_v22 = vadd.f32 %v137_v15, %v133_v21  ;;  %v186_v23 = vsel %vm174_vm4, %v184_v20, 0.0 }
 0x14c   :  { %187 = vadd.xlane.f32.xlu0 %v186_v23  ;;  %v3171_v24 = vpop.f32.mrf.mxu1 }
 0x14d   :  { %v178_v25 = vsel %vm174_vm4, %v3799_v22, 0.0  ;;  %v185_v26 = vmul.f32 %v3799_v22, %v3799_v22 }
 0x14e   :  { %179 = vadd.xlane.f32.xlu1 %v178_v25 }
 0x14f   :  { %v189_v27 = vsel %vm174_vm4, %v185_v26, 0.0 }
 0x152   :  { %190 = vadd.xlane.f32.xlu1 %v189_v27 }
 0x1d3   :  { %v177_v30 = vpop.xlane.xlu1 %176 }
 0x1d4   :  { %v182_v31 = vmul.f32 0.03125, %v177_v30 }
 0x1d5   :  { %v188_v32 = vpop.xlane.xlu0 %187 }
 0x1d6   :  { %v194_v33 = vmul.f32 %v182_v31, %v182_v31  ;;  %v192_v34 = vmul.f32 0.03125, %v188_v32  ;;  %v198_v48 = vsub.f32 %v3793_v17, %v182_v31 }
 0x1d7   :  { %v180_v35 = vpop.xlane.xlu1 %179 }
 0x1d8   :  { %v196_v36 = vsub.f32 %v192_v34, %v194_v33  ;;  %v183_v37 = vmul.f32 0.03125, %v180_v35 }
 0x1da   :  { %v200_v38 = vadd.f32 1e-05, %v196_v36  ;;  %v195_v40 = vmul.f32 %v183_v37, %v183_v37  ;;  %v199_v52 = vsub.f32 %v3799_v22, %v183_v37 }
 0x1db   :  { %v191_v39 = vpop.xlane.xlu1 %190 }
 0x1dc   :  { %3569 = vrsqrt.f32 %v200_v38  ;;  %v193_v41 = vmul.f32 0.03125, %v191_v39 }
 0x1de   :  { %v197_v42 = vsub.f32 %v193_v41, %v195_v40 }
 0x1e0   :  { %v201_v43 = vadd.f32 1e-05, %v197_v42 }
 0x1e2   :  { %3571 = vrsqrt.f32 %v201_v43  ;;  %v3683_v43 = vmov -1e+30  }
 0x1e9   :  { %v3570_v46 = vpop.eup %3569 }
 0x1ea   :  { %v204_v49 = vmul.f32 %v3570_v46, %v198_v48  ;;  %v3920_v46 = vsel %vm142_vm7, 0.0, %v3683_v43 }
 0x1ec   :  { %v210_v55 = vmul.f32 %v209_v50, %v204_v49 }
 0x1ee   :  { %v216_v58 = vadd.f32 %v215_v56, %v210_v55 }
 0x1ef   :  { %v3572_v53 = vpop.eup %3571 }
 0x1f0   :  { %v205_v54 = vmul.f32 %v3572_v53, %v199_v52 }
 0x1f2   :  { %v211_v57 = vmul.f32 %v209_v50, %v205_v54 }
 0x1f4   :  { %v217_v59 = vadd.f32 %v215_v56, %v211_v57 }
 0x1f6   :  { %v218_v60 = vpack.c.bf16 %v217_v59, %v216_v58 }
 0x1f8   :  { %3177 = vmatmul.mubr.msk.bf16.vlgmr.msra.gmra.mxu1 %vm174_vm4, %v218_v60 }
 0x1f9   :  { %3182 = vmatprep.mubr.msk.bf16.mxu1 %vm3677_vm0, %v3676_v2 }
 0x2b8   :  { %v268_v61 = vpop.f32.mrf.mxu1 }
 0x2b9   :  { %v295_v4 = vpack.c.bf16 %v268_v61, %v268_v61 }
 0x2ba   :  { %v3178_v62 = vpop.f32.mrf.mxu1 }
 0x2bc   :  { %v271_v63 = vpop.f32.mrf.mxu1 }
 0x2bd   :  { %v3475_v0 = vpack.i.bf16 %v271_v63, %v268_v61  ;;  %v296_v1 = vpack.c.bf16 %v271_v63, %v271_v63 }
 0x2be   :  { %v3179_v3 = vpop.f32.mrf.mxu1 }
 0x2bf   :  { %3476 = vrot.lane.b32.xlu1 %v3475_v0, %s3678_s20  ;;  %354 = vrot.lane.b32.xlu0 %v296_v1, %s3679_s21 }
 0x2c3   :  { %3481 = vrot.lane.b32.xlu1 %v3475_v0, %s3680_s22 }
 0x2c7   :  { %3486 = vrot.lane.b32.xlu1 %v3475_v0, %s3681_s23 }
 0x2cb   :  { %304 = vrot.lane.b32.xlu1 %v295_v4, %s3679_s21 }
 0x331   :  { %v3477_v5 = vpop.permute.xlu1 %3476  ;;  %v355_v6 = vpop.permute.xlu0 %354 }
 0x332   :  { %v3478_v7 = vunpack.i.l.bf16 %v3477_v5  ;;  %v360_v8 = vsel %vm306_vm5, %v355_v6, 0  ;;  %v3479_v10 = vunpack.i.h.bf16 %v3477_v5 }
 0x333   :  { %3187 = vmatpush3.bf16.xpose.msra.mxu0 %v360_v8 }
 0x334   :  { %v3843_v11 = vpack.c.bf16 %v3478_v7, %v3478_v7  ;;  %3198 = vmatprep.subr.bf16.mxu0 %v3676_v2  ;;  %v3848_v13 = vpack.c.bf16 %v3479_v10, %v3479_v10 }
 0x335   :  { %v3482_v12 = vpop.permute.xlu1 %3481 }
 0x336   :  { %403 = vrot.lane.b32.xlu1 %v3843_v11, %s3679_s21  ;;  %v3483_v14 = vunpack.i.l.bf16 %v3482_v12  ;;  %v3484_v18 = vunpack.i.h.bf16 %v3482_v12 }
 0x338   :  { %v3855_v19 = vpack.c.bf16 %v3483_v14, %v3483_v14  ;;  %v3864_v24 = vpack.c.bf16 %v3484_v18, %v3484_v18 }
 0x339   :  { %v3487_v15 = vpop.permute.xlu1 %3486 }
 0x33a   :  { %v3489_v16 = vunpack.i.h.bf16 %v3487_v15  ;;  %452 = vrot.lane.b32.xlu1 %v3848_v13, %s3679_s21  ;;  %3189 = vmatmul.mubr.msk.bf16.vlgmr.msra.gmra.mxu0 %vm306_vm5, %v296_v1  ;;  %v3488_v25 = vunpack.i.l.bf16 %v3487_v15 }
 0x33b   :  { %3200 = vmatprep.mubr.msk.bf16.mxu0 %vm3677_vm0, %v3676_v2 }
 0x33c   :  { %v3857_v20 = vpack.c.bf16 %v3489_v16, %v3489_v16  ;;  %v3870_v26 = vpack.c.bf16 %v3488_v25, %v3488_v25 }
 0x33d   :  { %v305_v21 = vpop.permute.xlu1 %304 }
 0x33e   :  { %v311_v23 = vsel %vm306_vm5, %v305_v21, 0  ;;  %501 = vrot.lane.b32.xlu1 %v3855_v19, %s3679_s21  ;;  %648 = vrot.lane.b32.xlu0 %v3857_v20, %s3679_s21 }
 0x33f   :  { %3181 = vmatpush3.bf16.xpose.msra.mxu1 %v311_v23 }
 0x340   :  { %3192 = vmatprep.subr.bf16.mxu1 %v3676_v2 }
 0x342   :  { %550 = vrot.lane.b32.xlu1 %v3864_v24, %s3679_s21  ;;  %792 = vrot.lane.b32.xlu0 %v295_v4, %s3682_s24 }
 0x346   :  { %3183 = vmatmul.mubr.msk.bf16.vlgmr.msra.gmra.mxu1 %vm306_vm5, %v295_v4  ;;  %599 = vrot.lane.b32.xlu1 %v3870_v26, %s3679_s21 }
 0x347   :  { %3194 = vmatprep.mubr.msk.bf16.mxu1 %vm3677_vm0, %v3676_v2 }
 0x34a   :  { %841 = vrot.lane.b32.xlu1 %v296_v1, %s3682_s24 }
 0x3a8   :  { %v404_v27 = vpop.permute.xlu1 %403 }
 0x3a9   :  { %v409_v28 = vsel %vm306_vm5, %v404_v27, 0 }
 0x3aa   :  { %3193 = vmatpush3.bf16.xpose.msra.mxu1 %v409_v28 }
 0x3ab   :  { %3204 = vmatprep.subr.bf16.mxu1 %v3676_v2 }
 0x3ac   :  { %v453_v29 = vpop.permute.xlu1 %452 }
 0x3ad   :  { %v458_v30 = vsel %vm306_vm5, %v453_v29, 0 }
 0x3ae   :  { %3199 = vmatpush3.bf16.xpose.msra.mxu0 %v458_v30 }
 0x3af   :  { %3210 = vmatprep.subr.bf16.mxu0 %v3676_v2 }
 0x3b0   :  { %v502_v31 = vpop.permute.xlu1 %501  ;;  %v649_v35 = vpop.permute.xlu0 %648 }
 0x3b1   :  { %v507_v32 = vsel %vm306_vm5, %v502_v31, 0  ;;  %3195 = vmatmul.mubr.msk.bf16.vlgmr.msra.gmra.mxu1 %vm306_vm5, %v3843_v11  ;;  %v654_v38 = vsel %vm306_vm5, %v649_v35, 0 }
 0x3b2   :  { %3205 = vmatpush3.bf16.xpose.msra.mxu1 %v507_v32  ;;  %3206 = vmatprep.mubr.msk.bf16.mxu1 %vm3677_vm0, %v3676_v2 }
 0x3b3   :  { %3216 = vmatprep.subr.bf16.mxu1 %v3676_v2 }
 0x3b4   :  { %v551_v33 = vpop.permute.xlu1 %550  ;;  %v793_v39 = vpop.permute.xlu0 %792 }
 0x3b5   :  { %v556_v34 = vsel %vm306_vm5, %v551_v33, 0  ;;  %3201 = vmatmul.mubr.msk.bf16.vlgmr.msra.gmra.mxu0 %vm306_vm5, %v3848_v13  ;;  %v799_v40 = vsel %vm797_vm6, %v793_v39, 0 }
 0x3b6   :  { %3211 = vmatpush3.bf16.xpose.msra.mxu0 %v556_v34  ;;  %3212 = vmatprep.mubr.msk.bf16.mxu0 %vm3677_vm0, %v3676_v2 }
 0x3b7   :  { %3222 = vmatprep.subr.bf16.mxu0 %v3676_v2 }
 0x3b8   :  { %v600_v36 = vpop.permute.xlu1 %599 }
 0x3b9   :  { %v605_v37 = vsel %vm306_vm5, %v600_v36, 0  ;;  %3207 = vmatmul.mubr.msk.bf16.vlgmr.msra.gmra.mxu1 %vm306_vm5, %v3855_v19 }
 0x3ba   :  { %3217 = vmatpush3.bf16.xpose.msra.mxu1 %v605_v37  ;;  %3218 = vmatprep.mubr.msk.bf16.mxu1 %vm3677_vm0, %v3676_v2 }
 0x3bb   :  { %3228 = vmatprep.subr.bf16.mxu1 %v3676_v2 }
 0x3bc   :  { %v842_v41 = vpop.permute.xlu1 %841 }
 0x3bd   :  { %3213 = vmatmul.mubr.msk.bf16.vlgmr.msra.gmra.mxu0 %vm306_vm5, %v3864_v24  ;;  %v847_v42 = vsel %vm797_vm6, %v842_v41, 0 }
 0x3be   :  { %3223 = vmatpush3.bf16.xpose.msra.mxu0 %v654_v38  ;;  %3224 = vmatprep.mubr.msk.bf16.mxu0 %vm3677_vm0, %v3676_v2 }
 0x3bf   :  { %3234 = vmatprep.subr.bf16.mxu0 %v3676_v2 }
 0x3c1   :  { %3219 = vmatmul.mubr.msk.bf16.vlgmr.msra.gmra.mxu1 %vm306_vm5, %v3870_v26 }
 0x3c2   :  { %3229 = vmatpush3.bf16.msra.mxu1 %v799_v40  ;;  %3230 = vmatprep.mubr.msk.bf16.mxu1 %vm3677_vm0, %v3676_v2 }
 0x3c3   :  { %3240 = vmatprep.subr.bf16.mxu1 %v3676_v2 }
 0x3c5   :  { %3225 = vmatmul.mubr.msk.bf16.vlgmr.msra.gmra.mxu0 %vm306_vm5, %v3857_v20 }
 0x3c6   :  { %3235 = vmatpush3.bf16.msra.mxu0 %v847_v42  ;;  %3236 = vmatprep.mubr.msk.bf16.mxu0 %vm3677_vm0, %v3676_v2 }
 0x3c7   :  { %3246 = vmatprep.subr.bf16.mxu0 %v3676_v2 }
 0x3fa   :  { %v396_v48 = vpop.f32.mrf.mxu0 }
 0x3fb   :  { %v397_v49 = vadd.f32 %v396_v48, %v3920_v46 }
 0x3fc   :  { %v3190_v50 = vpop.f32.mrf.mxu0 }
 0x3fd   :  { %v699_v52 = vsel %vm306_vm5, %v397_v49, -inf }
 0x3fe   :  { %700 = vmax.xlane.f32.xlu0 %v699_v52  ;;  %v399_v53 = vpop.f32.mrf.mxu0 }
 0x400   :  { %v3191_v54 = vpop.f32.mrf.mxu0 }
 0x406   :  { %v347_v55 = vpop.f32.mrf.mxu1 }
 0x407   :  { %v348_v56 = vadd.f32 %v347_v55, %v3920_v46 }
 0x408   :  { %v3184_v57 = vpop.f32.mrf.mxu1 }
 0x409   :  { %v696_v58 = vsel %vm306_vm5, %v348_v56, -inf }
 0x40a   :  { %697 = vmax.xlane.f32.xlu1 %v696_v58  ;;  %v350_v9 = vpop.f32.mrf.mxu1 }
 0x40c   :  { %v3185_v59 = vpop.f32.mrf.mxu1 }
 0x471   :  { %v445_v60 = vpop.f32.mrf.mxu1 }
 0x472   :  { %v446_v61 = vadd.f32 %v445_v60, %v3920_v46 }
 0x473   :  { %v3196_v62 = vpop.f32.mrf.mxu1 }
 0x474   :  { %v702_v63 = vsel %vm306_vm5, %v446_v61, -inf }
 0x475   :  { %v494_v0 = vpop.f32.mrf.mxu0  ;;  %703 = vmax.xlane.f32.xlu0 %v702_v63  ;;  %v448_v1 = vpop.f32.mrf.mxu1 }
 0x476   :  { %v495_v3 = vadd.f32 %v494_v0, %v3920_v46 }
 0x477   :  { %v3197_v4 = vpop.f32.mrf.mxu1  ;;  %v3202_v5 = vpop.f32.mrf.mxu0 }
 0x478   :  { %v705_v6 = vsel %vm306_vm5, %v495_v3, -inf }
 0x479   :  { %v497_v7 = vpop.f32.mrf.mxu0  ;;  %706 = vmax.xlane.f32.xlu1 %v705_v6  ;;  %v543_v8 = vpop.f32.mrf.mxu1 }
 0x47a   :  { %v3931_v10 = vadd.f32 %v543_v8, %v3920_v46 }
 0x47b   :  { %v3203_v12 = vpop.f32.mrf.mxu0  ;;  %v3208_v14 = vpop.f32.mrf.mxu1 }
 0x47c   :  { %v708_v15 = vsel %vm306_vm5, %v3931_v10, -inf }
 0x47d   :  { %v592_v16 = vpop.f32.mrf.mxu0  ;;  %709 = vmax.xlane.f32.xlu0 %v708_v15  ;;  %v546_v18 = vpop.f32.mrf.mxu1 }
 0x47e   :  { %v593_v21 = vadd.f32 %v592_v16, %v3920_v46 }
 0x47f   :  { %v3209_v23 = vpop.f32.mrf.mxu1  ;;  %v3214_v25 = vpop.f32.mrf.mxu0 }
 0x480   :  { %v711_v27 = vsel %vm306_vm5, %v593_v21, -inf }
 0x481   :  { %v595_v28 = vpop.f32.mrf.mxu0  ;;  %712 = vmax.xlane.f32.xlu1 %v711_v27  ;;  %v641_v29 = vpop.f32.mrf.mxu1 }
 0x482   :  { %v3938_v30 = vadd.f32 %v641_v29, %v3920_v46 }
 0x483   :  { %v3215_v31 = vpop.f32.mrf.mxu0  ;;  %v3220_v32 = vpop.f32.mrf.mxu1 }
 0x484   :  { %v714_v33 = vsel %vm306_vm5, %v3938_v30, -inf }
 0x485   :  { %v690_v34 = vpop.f32.mrf.mxu0  ;;  %715 = vmax.xlane.f32.xlu0 %v714_v33  ;;  %v644_v35 = vpop.f32.mrf.mxu1 }
 0x486   :  { %v691_v36 = vadd.f32 %v690_v34, %v3920_v46 }
 0x487   :  { %v3226_v37 = vpop.f32.mrf.mxu0  ;;  %v3221_v38 = vpop.f32.mrf.mxu1 }
 0x488   :  { %v717_v39 = vsel %vm306_vm5, %v691_v36, -inf  ;;  %v701_v48 = vpop.xlane.xlu0 %700 }
 0x489   :  { %v693_v40 = vpop.f32.mrf.mxu0  ;;  %718 = vmax.xlane.f32.xlu1 %v717_v39  ;;  %v721_v50 = vsub.f32 %v397_v49, %v701_v48 }
 0x48b   :  { %v3227_v41 = vpop.f32.mrf.mxu0  ;;  %v730_v53 = vmul.f32 1.442695, %v721_v50 }
 0x493   :  { %v698_v42 = vpop.xlane.xlu1 %697 }
 0x494   :  { %v720_v43 = vsub.f32 %v348_v56, %v698_v42 }
 0x496   :  { %v728_v52 = vmul.f32 1.442695, %v720_v43 }
 0x498   :  { %3573 = vpow2.f32 %v728_v52 }
 0x499   :  { %3575 = vpow2.f32 %v730_v53 }
 0x49a   :  { %889 = vrot.lane.b32.xlu1 %v3843_v11, %s3682_s24 }
 0x49b   :  { %937 = vrot.lane.b32.xlu0 %v3848_v13, %s3682_s24 }
 0x4a5   :  { %v3574_v54 = vpop.eup %3573 }
 0x4a6   :  { %v744_v55 = vsel %vm306_vm5, %v3574_v54, 0.0  ;;  %v3576_v57 = vpop.eup %3575 }
 0x4a7   :  { %v747_v58 = vsel %vm306_vm5, %v3576_v57, 0.0 }
 0x4ba   :  { %745 = vadd.xlane.f32.xlu0 %v744_v55 }
 0x4be   :  { %748 = vadd.xlane.f32.xlu1 %v747_v58 }
 0x4cf   :  { %985 = vrot.lane.b32.xlu1 %v3855_v19, %s3682_s24 }
 0x4fe   :  { %v704_v11 = vpop.xlane.xlu0 %703 }
 0x4ff   :  { %v722_v13 = vsub.f32 %v446_v61, %v704_v11 }
 0x501   :  { %v732_v56 = vmul.f32 1.442695, %v722_v13 }
 0x502   :  { %v707_v9 = vpop.xlane.xlu1 %706 }
 0x503   :  { %3577 = vpow2.f32 %v732_v56  ;;  %v723_v49 = vsub.f32 %v495_v3, %v707_v9 }
 0x505   :  { %v734_v59 = vmul.f32 1.442695, %v723_v49 }
 0x506   :  { %v710_v14 = vpop.xlane.xlu0 %709 }
 0x507   :  { %3579 = vpow2.f32 %v734_v59  ;;  %v724_v15 = vsub.f32 %v3931_v10, %v710_v14 }
 0x509   :  { %v736_v18 = vmul.f32 1.442695, %v724_v15 }
 0x50a   :  { %v713_v60 = vpop.xlane.xlu1 %712 }
 0x50b   :  { %v725_v62 = vsub.f32 %v593_v21, %v713_v60 }
 0x50d   :  { %v738_v63 = vmul.f32 1.442695, %v725_v62 }
 0x50e   :  { %v716_v16 = vpop.xlane.xlu0 %715 }
 0x50f   :  { %3581 = vpow2.f32 %v738_v63  ;;  %v726_v21 = vsub.f32 %v3938_v30, %v716_v16 }
 0x510   :  { %v3952_v0 = vpop.eup %3577 }
 0x511   :  { %v750_v1 = vsel %vm306_vm5, %v3952_v0, 0.0  ;;  %v740_v23 = vmul.f32 1.442695, %v726_v21 }
 0x512   :  { %v719_v4 = vpop.xlane.xlu1 %718  ;;  %751 = vadd.xlane.f32.xlu0 %v750_v1  ;;  %v938_v25 = vpop.permute.xlu0 %937 }
 0x513   :  { %v727_v19 = vsub.f32 %v691_v36, %v719_v4  ;;  %v943_v38 = vsel %vm797_vm6, %v938_v25, 0 }
 0x514   :  { %v3956_v5 = vpop.eup %3579 }
 0x515   :  { %v742_v61 = vmul.f32 1.442695, %v727_v19  ;;  %v753_v3 = vsel %vm306_vm5, %v3956_v5, 0.0 }
 0x516   :  { %754 = vadd.xlane.f32.xlu1 %v753_v3  ;;  %v890_v28 = vpop.permute.xlu1 %889 }
 0x517   :  { %3583 = vpow2.f32 %v742_v61  ;;  %v895_v35 = vsel %vm797_vm6, %v890_v28, 0 }
 0x518   :  { %3585 = vpow2.f32 %v736_v18 }
 0x519   :  { %3587 = vpow2.f32 %v740_v23 }
 0x51c   :  { %v3960_v6 = vpop.eup %3581 }
 0x51d   :  { %v759_v7 = vsel %vm306_vm5, %v3960_v6, 0.0 }
 0x51e   :  { %760 = vadd.xlane.f32.xlu1 %v759_v7 }
 0x524   :  { %v3964_v8 = vpop.eup %3583 }
 0x525   :  { %v765_v12 = vsel %vm306_vm5, %v3964_v8, 0.0  ;;  %v3974_v27 = vpop.eup %3585 }
 0x526   :  { %766 = vadd.xlane.f32.xlu1 %v765_v12  ;;  %v3978_v10 = vpop.eup %3587 }
 0x527   :  { %v762_v30 = vsel %vm306_vm5, %v3978_v10, 0.0 }
 0x528   :  { %1033 = vrot.lane.b32.xlu0 %v3864_v24, %s3682_s24  ;;  %v756_v24 = vsel %vm306_vm5, %v3974_v27, 0.0 }
 0x537   :  { %1081 = vrot.lane.b32.xlu1 %v3870_v26, %s3682_s24 }
 0x543   :  { %v746_v29 = vpop.xlane.xlu0 %745 }
 0x544   :  { %3589 = vrcp.f32 %v746_v29 }
 0x547   :  { %v749_v31 = vpop.xlane.xlu1 %748  ;;  %757 = vadd.xlane.f32.xlu0 %v756_v24 }
 0x548   :  { %3591 = vrcp.f32 %v749_v31 }
 0x54b   :  { %763 = vadd.xlane.f32.xlu0 %v762_v30  ;;  %v986_v39 = vpop.permute.xlu1 %985 }
 0x54c   :  { %v991_v53 = vsel %vm797_vm6, %v986_v39, 0 }
 0x551   :  { %v3590_v26 = vpop.eup %3589 }
 0x552   :  { %v776_v32 = vmul.f32 %v3590_v26, %v3574_v54 }
 0x554   :  { %v784_v33 = vpack.c.bf16 %v776_v32, %v776_v32 }
 0x555   :  { %v3592_v34 = vpop.eup %3591 }
 0x556   :  { %3231 = vmatmul.mubr.msk.bf16.vlgmr.msra.gmra.mxu1 %vm306_vm5, %v784_v33  ;;  %v777_v36 = vmul.f32 %v3592_v34, %v3576_v57 }
 0x557   :  { %3241 = vmatpush3.bf16.msra.mxu1 %v895_v35  ;;  %3242 = vmatprep.mubr.msk.bf16.mxu1 %vm3677_vm0, %v3676_v2 }
 0x558   :  { %v785_v37 = vpack.c.bf16 %v777_v36, %v777_v36  ;;  %3252 = vmatprep.subr.bf16.mxu1 %v3676_v2  ;;  %v3541_v36 = vld [vmem:[%s4468_s4 + $0x8] sm:$0xff]  }
 0x55a   :  { %3237 = vmatmul.mubr.msk.bf16.vlgmr.msra.gmra.mxu0 %vm306_vm5, %v785_v37 }
 0x55b   :  { %3247 = vmatpush3.bf16.msra.mxu0 %v943_v38  ;;  %3248 = vmatprep.mubr.msk.bf16.mxu0 %vm3677_vm0, %v3676_v2 }
 0x55c   :  { %3258 = vmatprep.subr.bf16.mxu0 %v3676_v2 }
 0x561   :  { %1129 = vrot.lane.b32.xlu0 %v3857_v20, %s3682_s24 }
 0x59b   :  { %v752_v40 = vpop.xlane.xlu0 %751 }
 0x59c   :  { %3593 = vrcp.f32 %v752_v40  ;;  %v3542_v40 = vld [vmem:[%s4468_s4] sm:$0xff]  }
 0x59f   :  { %v755_v41 = vpop.xlane.xlu1 %754  ;;  %v1034_v55 = vpop.permute.xlu0 %1033 }
 0x5a0   :  { %3595 = vrcp.f32 %v755_v41  ;;  %v1039_v57 = vsel %vm797_vm6, %v1034_v55, 0 }
 0x5a7   :  { %v761_v42 = vpop.xlane.xlu1 %760 }
 0x5a8   :  { %3597 = vrcp.f32 %v761_v42 }
 0x5a9   :  { %v3594_v43 = vpop.eup %3593 }
 0x5aa   :  { %v778_v48 = vmul.f32 %v3594_v43, %v3952_v0 }
 0x5ac   :  { %v786_v50 = vpack.c.bf16 %v778_v48, %v778_v48 }
 0x5ad   :  { %v3596_v52 = vpop.eup %3595 }
 0x5ae   :  { %3243 = vmatmul.mubr.msk.bf16.vlgmr.msra.gmra.mxu1 %vm306_vm5, %v786_v50  ;;  %v779_v54 = vmul.f32 %v3596_v52, %v3956_v5 }
 0x5af   :  { %3253 = vmatpush3.bf16.msra.mxu1 %v991_v53  ;;  %3254 = vmatprep.mubr.msk.bf16.mxu1 %vm3677_vm0, %v3676_v2  ;;  %v767_v56 = vpop.xlane.xlu1 %766 }
 0x5b0   :  { %v787_v20 = vpack.c.bf16 %v779_v54, %v779_v54  ;;  %3264 = vmatprep.subr.bf16.mxu1 %v3676_v2  ;;  %3599 = vrcp.f32 %v767_v56 }
 0x5b2   :  { %3249 = vmatmul.mubr.msk.bf16.vlgmr.msra.gmra.mxu0 %vm306_vm5, %v787_v20 }
 0x5b3   :  { %3259 = vmatpush3.bf16.msra.mxu0 %v1039_v57  ;;  %3260 = vmatprep.mubr.msk.bf16.mxu0 %vm3677_vm0, %v3676_v2  ;;  %v1082_v19 = vpop.permute.xlu1 %1081 }
 0x5b4   :  { %3270 = vmatprep.subr.bf16.mxu0 %v3676_v2  ;;  %v1087_v3 = vsel %vm797_vm6, %v1082_v19, 0 }
 0x5b5   :  { %v3598_v58 = vpop.eup %3597 }
 0x5b6   :  { %v781_v11 = vmul.f32 %v3598_v58, %v3960_v6 }
 0x5b8   :  { %v789_v13 = vpack.c.bf16 %v781_v11, %v781_v11 }
 0x5ba   :  { %3261 = vmatmul.mubr.msk.bf16.vlgmr.msra.gmra.mxu0 %vm306_vm5, %v789_v13 }
 0x5bb   :  { %3272 = vmatprep.mubr.msk.bf16.mxu0 %vm3677_vm0, %v3676_v2 }
 0x5bd   :  { %v3600_v49 = vpop.eup %3599 }
 0x5be   :  { %v783_v60 = vmul.f32 %v3600_v49, %v3964_v8 }
 0x5c0   :  { %v791_v0 = vpack.c.bf16 %v783_v60, %v783_v60 }
 0x5d0   :  { %v758_v9 = vpop.xlane.xlu0 %757 }
 0x5d1   :  { %3601 = vrcp.f32 %v758_v9 }
 0x5d4   :  { %v764_v59 = vpop.xlane.xlu0 %763 }
 0x5d5   :  { %3603 = vrcp.f32 %v764_v59 }
 0x5d8   :  { %v1130_v62 = vpop.permute.xlu0 %1129 }
 0x5d9   :  { %v1135_v63 = vsel %vm797_vm6, %v1130_v62, 0 }
 0x5da   :  { %3271 = vmatpush3.bf16.msra.mxu0 %v1135_v63 }
 0x5db   :  { %3284 = vmatprep.subr.bf16.mxu0 %v3676_v2 }
 0x5dd   :  { %3273 = vmatmul.mubr.msk.bf16.vlgmr.msra.gmra.mxu0 %vm306_vm5, %v791_v0 }
 0x5de   :  { %v3602_v1 = vpop.eup %3601  ;;  %3288 = vmatprep.mubr.msk.bf16.mxu0 %vm3677_vm0, %v3676_v2 }
 0x5df   :  { %v780_v4 = vmul.f32 %v3602_v1, %v3974_v27 }
 0x5e1   :  { %v788_v5 = vpack.c.bf16 %v780_v4, %v780_v4 }
 0x5e2   :  { %v3604_v61 = vpop.eup %3603 }
 0x5e3   :  { %3255 = vmatmul.mubr.msk.bf16.vlgmr.msra.gmra.mxu1 %vm306_vm5, %v788_v5  ;;  %v782_v6 = vmul.f32 %v3604_v61, %v3978_v10 }
 0x5e4   :  { %3265 = vmatpush3.bf16.msra.mxu1 %v1087_v3  ;;  %3266 = vmatprep.mubr.msk.bf16.mxu1 %vm3677_vm0, %v3676_v2  ;;  %v1270_v3 = vsub.s32 4, %v3815_v44 }
 0x5e5   :  { %3276 = vmatprep.subr.bf16.mxu1 %v3676_v2  ;;  %v790_v7 = vpack.c.bf16 %v782_v6, %v782_v6 }
 0x5e6   :  { %v1271_v6 = vrot.slane %v3823_v47, %v1270_v3 }
 0x5eb   :  { %3267 = vmatmul.mubr.msk.bf16.vlgmr.msra.gmra.mxu1 %vm306_vm5, %v790_v7 }
 0x5ec   :  { %3280 = vmatprep.mubr.msk.bf16.mxu1 %vm3677_vm0, %v3676_v2  ;;  %3277 = vmatpush3.bf16.msra.mxu1 %v3541_v36 }
 0x5ed   :  { %3278 = vmatprep.subr.bf16.mxu1 %v3676_v2 }
 0x5f0   :  { %3279 = vmatpush3.bf16.msra.mxu1 %v3542_v40 }
 0x5f1   :  { %3292 = vmatprep.subr.bf16.mxu1 %v3676_v2 }
 0x616   :  { %v835_v8 = vpop.f32.mrf.mxu1 }
 0x618   :  { %v3232_v12 = vpop.f32.mrf.mxu1 }
 0x61a   :  { %v838_v14 = vpop.f32.mrf.mxu1  ;;  %v883_v15 = vpop.f32.mrf.mxu0 }
 0x61c   :  { %v3233_v16 = vpop.f32.mrf.mxu1  ;;  %v3238_v18 = vpop.f32.mrf.mxu0 }
 0x61e   :  { %v886_v21 = vpop.f32.mrf.mxu0 }
 0x620   :  { %v3239_v23 = vpop.f32.mrf.mxu0 }
 0x66e   :  { %v931_v25 = vpop.f32.mrf.mxu1 }
 0x670   :  { %v3244_v27 = vpop.f32.mrf.mxu1 }
 0x672   :  { %v934_v28 = vpop.f32.mrf.mxu1  ;;  %v979_v29 = vpop.f32.mrf.mxu0 }
 0x673   :  { %v3490_v24 = vpack.i.bf16 %v979_v29, %v931_v25  ;;  %v3543_v29 = vld [vmem:[%s4469_s5 + $0x8] sm:$0xff]  }
 0x674   :  { %v3245_v10 = vpop.f32.mrf.mxu1  ;;  %v3250_v31 = vpop.f32.mrf.mxu0  ;;  %3285 = vmatpush3.bf16.msra.mxu0 %v3543_v29 }
 0x675   :  { %3491 = vrot.lane.b32.xlu1 %v3490_v24, %s3684_s25  ;;  %v3544_v24 = vld [vmem:[%s4469_s5] sm:$0xff]   ;;  %3286 = vmatprep.subr.bf16.mxu0 %v3676_v2  ;;  %v3545_v10 = vld [vmem:[%s4470_s6 + $0x38] sm:$0xff]   ;;  %v3546_v31 = vld [vmem:[%s4470_s6 + $0x30] sm:$0xff]  }
 0x676   :  { %v982_v30 = vpop.f32.mrf.mxu0 }
 0x677   :  { %v3547_v30 = vld [vmem:[%s4470_s6 + $0x28] sm:$0xff]  }
 0x678   :  { %v3251_v26 = vpop.f32.mrf.mxu0  ;;  %3287 = vmatpush3.bf16.msra.mxu0 %v3544_v24 }
 0x679   :  { %3312 = vmatprep.subr.bf16.mxu0 %v3676_v2  ;;  %v3548_v26 = vld [vmem:[%s4470_s6 + $0x20] sm:$0xff]  }
 0x67a   :  { %v1075_v32 = vpop.f32.mrf.mxu0 }
 0x67c   :  { %v3262_v33 = vpop.f32.mrf.mxu0 }
 0x67e   :  { %v1078_v34 = vpop.f32.mrf.mxu0 }
 0x680   :  { %v3263_v35 = vpop.f32.mrf.mxu0 }
 0x69d   :  { %v1171_v37 = vpop.f32.mrf.mxu0 }
 0x69f   :  { %v3274_v38 = vpop.f32.mrf.mxu0 }
 0x6a1   :  { %v1174_v39 = vpop.f32.mrf.mxu0 }
 0x6a3   :  { %v1027_v41 = vpop.f32.mrf.mxu1  ;;  %v3275_v42 = vpop.f32.mrf.mxu0 }
 0x6a4   :  { %v3495_v43 = vpack.i.bf16 %v1075_v32, %v1027_v41  ;;  %v3549_v32 = vld [vmem:[%s4470_s6 + $0x18] sm:$0xff]  }
 0x6a5   :  { %v3256_v48 = vpop.f32.mrf.mxu1 }
 0x6a6   :  { %3496 = vrot.lane.b32.xlu0 %v3495_v43, %s3685_s30 }
 0x6a7   :  { %v1030_v50 = vpop.f32.mrf.mxu1 }
 0x6a9   :  { %v3257_v52 = vpop.f32.mrf.mxu1 }
 0x6ab   :  { %v1123_v53 = vpop.f32.mrf.mxu1 }
 0x6ac   :  { %v3500_v54 = vpack.i.bf16 %v1171_v37, %v1123_v53  ;;  %v1306_v53 = vsub.s32 2, %v3815_v44 }
 0x6ad   :  { %v3268_v55 = vpop.f32.mrf.mxu1 }
 0x6ae   :  { %3501 = vrot.lane.b32.xlu1 %v3500_v54, %s3686_s0 }
 0x6af   :  { %v1126_v20 = vpop.f32.mrf.mxu1 }
 0x6b1   :  { %v3269_v57 = vpop.f32.mrf.mxu1 }
 0x6b2   :  { %v1307_v57 = vrot.slane %v3823_v47, %v1306_v53 }
 0x6e7   :  { %v3492_v58 = vpop.permute.xlu1 %3491 }
 0x6e8   :  { %v3494_v13 = vunpack.i.h.bf16 %v3492_v58  ;;  %v3493_v56 = vunpack.i.l.bf16 %v3492_v58  ;;  %v1312_v58 = vsub.s32 3, %v3815_v44 }
 0x6ea   :  { %v1202_v60 = vsel %vm306_vm5, %v883_v15, %v3494_v13  ;;  %v1201_v62 = vsel %vm306_vm5, %v835_v8, %v3493_v56 }
 0x718   :  { %v3497_v11 = vpop.permute.xlu0 %3496 }
 0x719   :  { %v3499_v9 = vunpack.i.h.bf16 %v3497_v11  ;;  %v3498_v49 = vunpack.i.l.bf16 %v3497_v11 }
 0x71b   :  { %v1205_v1 = vsel %vm1203_vm8, %v1202_v60, %v3499_v9  ;;  %v1204_v4 = vsel %vm1203_vm8, %v1201_v62, %v3498_v49  ;;  %v1313_v49 = vrot.slane %v3823_v47, %v1312_v58 }
 0x720   :  { %v3502_v59 = vpop.permute.xlu1 %3501 }
 0x721   :  { %v3504_v63 = vunpack.i.h.bf16 %v3502_v59  ;;  %v3503_v0 = vunpack.i.l.bf16 %v3502_v59 }
 0x723   :  { %v1208_v19 = vsel %vm1206_vm9, %v1205_v1, %v3504_v63  ;;  %v1207_v5 = vsel %vm1206_vm9, %v1204_v4, %v3503_v0  ;;  %v3550_v0 = vld [vmem:[%s4470_s6 + $0x10] sm:$0xff]   ;;  %v3551_v1 = vld [vmem:[%s4470_s6 + $0x8] sm:$0xff]   ;;  %v3552_v4 = vld [vmem:[%s4470_s6] sm:$0xff]  }
 0x724   :  { %v1209_v61 = vpack.c.bf16 %v1208_v19, %v1207_v5  ;;  %v2972_v19 = vld [vmem:[%s4472_s8] ss:$0 sm:$0xff] }
 0x726   :  { %3281 = vmatmul.mubr.msk.bf16.vlgmr.msra.gmra.mxu1 %vm174_vm4, %v1209_v61 }
 0x727   :  { %3308 = vmatprep.mubr.msk.bf16.mxu1 %vm3677_vm0, %v3676_v2  ;;  %3293 = vmatpush3.bf16.msra.mxu1 %v3545_v10 }
 0x728   :  { %3294 = vmatprep.subr.bf16.mxu1 %v3676_v2 }
 0x72b   :  { %3295 = vmatpush3.bf16.msra.mxu1 %v3546_v31 }
 0x72c   :  { %3296 = vmatprep.subr.bf16.mxu1 %v3676_v2 }
 0x72f   :  { %3297 = vmatpush3.bf16.msra.mxu1 %v3547_v30 }
 0x730   :  { %3298 = vmatprep.subr.bf16.mxu1 %v3676_v2 }
 0x733   :  { %3299 = vmatpush3.bf16.msra.mxu1 %v3548_v26 }
 0x734   :  { %3300 = vmatprep.subr.bf16.mxu1 %v3676_v2 }
 0x737   :  { %3301 = vmatpush3.bf16.msra.mxu1 %v3549_v32 }
 0x738   :  { %3302 = vmatprep.subr.bf16.mxu1 %v3676_v2 }
 0x73b   :  { %3303 = vmatpush3.bf16.msra.mxu1 %v3550_v0 }
 0x73c   :  { %3304 = vmatprep.subr.bf16.mxu1 %v3676_v2 }
 0x73f   :  { %3305 = vmatpush3.bf16.msra.mxu1 %v3551_v1 }
 0x740   :  { %3306 = vmatprep.subr.bf16.mxu1 %v3676_v2 }
 0x743   :  { %3307 = vmatpush3.bf16.msra.mxu1 %v3552_v4 }
 0x744   :  { %3338 = vmatprep.subr.bf16.mxu1 %v3676_v2 }
 0x7e6   :  { %v1259_v7 = vpop.f32.mrf.mxu1 }
 0x7e7   :  { %v1266_v8 = vadd.f32 %v1259_v7, %v3793_v17 }
 0x7e8   :  { %v3282_v12 = vpop.f32.mrf.mxu1 }
 0x7e9   :  { %v4051_v14 = vadd.f32 %v1271_v6, %v1266_v8 }
 0x7ea   :  { %v1262_v15 = vpop.f32.mrf.mxu1 }
 0x7eb   :  { %v1267_v16 = vadd.f32 %v1262_v15, %v3799_v22  ;;  %v1274_v18 = vsel %vm174_vm4, %v4051_v14, 0.0  ;;  %v1282_v21 = vmul.f32 %v4051_v14, %v4051_v14 }
 0x7ec   :  { %1275 = vadd.xlane.f32.xlu0 %v1274_v18  ;;  %v3283_v23 = vpop.f32.mrf.mxu1 }
 0x7ed   :  { %v4058_v25 = vadd.f32 %v1271_v6, %v1267_v16  ;;  %v1284_v27 = vsel %vm174_vm4, %v1282_v21, 0.0  ;;  %v1475_v21 = vsub.s32 5, %v3815_v44 }
 0x7ef   :  { %v1277_v17 = vsel %vm174_vm4, %v4058_v25, 0.0  ;;  %v1283_v28 = vmul.f32 %v4058_v25, %v4058_v25  ;;  %v1476_v23 = vrot.slane %v3823_v47, %v1475_v21 }
 0x7f0   :  { %1285 = vadd.xlane.f32.xlu0 %v1284_v27  ;;  %1278 = vadd.xlane.f32.xlu1 %v1277_v17 }
 0x7f1   :  { %v1287_v22 = vsel %vm174_vm4, %v1283_v28, 0.0 }
 0x7f4   :  { %1288 = vadd.xlane.f32.xlu0 %v1287_v22 }
 0x875   :  { %v1276_v33 = vpop.xlane.xlu0 %1275 }
 0x876   :  { %v1280_v34 = vmul.f32 0.03125, %v1276_v33  ;;  %v3553_v33 = vld [vmem:[%s4467_s3 + $0x18] sm:$0xff]  }
 0x878   :  { %v1292_v37 = vmul.f32 %v1280_v34, %v1280_v34  ;;  %v1296_v54 = vsub.f32 %v4051_v14, %v1280_v34  ;;  %v3554_v34 = vld [vmem:[%s4467_s3 + $0x10] sm:$0xff]  }
 0x879   :  { %v1286_v35 = vpop.xlane.xlu0 %1285  ;;  %v1279_v36 = vpop.xlane.xlu1 %1278 }
 0x87a   :  { %v1290_v38 = vmul.f32 0.03125, %v1286_v35  ;;  %v1281_v39 = vmul.f32 0.03125, %v1279_v36 }
 0x87c   :  { %v1294_v40 = vsub.f32 %v1290_v38, %v1292_v37  ;;  %v1293_v43 = vmul.f32 %v1281_v39, %v1281_v39  ;;  %v1297_v11 = vsub.f32 %v4058_v25, %v1281_v39 }
 0x87d   :  { %v1289_v41 = vpop.xlane.xlu0 %1288 }
 0x87e   :  { %v1298_v42 = vadd.f32 1e-05, %v1294_v40  ;;  %v1291_v48 = vmul.f32 0.03125, %v1289_v41 }
 0x880   :  { %3605 = vrsqrt.f32 %v1298_v42  ;;  %v1295_v50 = vsub.f32 %v1291_v48, %v1293_v43 }
 0x882   :  { %v1299_v52 = vadd.f32 1e-05, %v1295_v50 }
 0x884   :  { %3607 = vrsqrt.f32 %v1299_v52 }
 0x88d   :  { %v3606_v55 = vpop.eup %3605 }
 0x88e   :  { %v1302_v20 = vmul.f32 %v3606_v55, %v1296_v54 }
 0x890   :  { %v1308_v9 = vmul.f32 %v1307_v57, %v1302_v20  ;;  %v4155_v20 = vld [vmem:[%s4471_s7 + $0x8] sm:$0x3f] }
 0x891   :  { %v3608_v13 = vpop.eup %3607 }
 0x892   :  { %v1303_v56 = vmul.f32 %v3608_v13, %v1297_v11  ;;  %v1314_v60 = vadd.f32 %v1313_v49, %v1308_v9 }
 0x894   :  { %v1309_v59 = vmul.f32 %v1307_v57, %v1303_v56  ;;  %v1548_v56 = vrot.slane %v4155_v20, %v3818_v45 }
 0x896   :  { %v1315_v62 = vadd.f32 %v1313_v49, %v1309_v59 }
 0x898   :  { %v1316_v63 = vpack.c.bf16 %v1315_v62, %v1314_v60  ;;  %v1554_v62 = vrot.slane %v4155_v20, %v3829_v51 }
 0x89a   :  { %3289 = vmatmul.mubr.msk.bf16.vlgmr.msra.gmra.mxu0 %vm174_vm4, %v1316_v63 }
 0x89b   :  { %3316 = vmatprep.mubr.msk.bf16.mxu0 %vm3677_vm0, %v3676_v2  ;;  %3313 = vmatpush3.bf16.msra.mxu0 %v3553_v33 }
 0x89c   :  { %3314 = vmatprep.subr.bf16.mxu0 %v3676_v2 }
 0x89f   :  { %3315 = vmatpush3.bf16.msra.mxu0 %v3554_v34 }
 0x8a0   :  { %3320 = vmatprep.subr.bf16.mxu0 %v3676_v2 }
 0x95a   :  { %v1372_v5 = vpop.f32.mrf.mxu0 }
 0x95b   :  { %v1373_v6 = vadd.f32 %v2972_v19, %v1372_v5 }
 0x95c   :  { %v3290_v61 = vpop.f32.mrf.mxu0 }
 0x95d   :  { %v1379_v15 = vmax.f32 %v1373_v6, 0.0 }
 0x95e   :  { %v1375_v7 = vpop.f32.mrf.mxu0 }
 0x95f   :  { %v1376_v8 = vadd.f32 %v2972_v19, %v1375_v7 }
 0x960   :  { %v3291_v12 = vpop.f32.mrf.mxu0 }
 0x961   :  { %v1380_v16 = vmax.f32 %v1376_v8, 0.0 }
 0x963   :  { %v1381_v18 = vpack.c.bf16 %v1380_v16, %v1379_v15 }
 0x965   :  { %3309 = vmatmul.mubr.bf16.vlgmr.msra.gmra.mxu1 %v1381_v18 }
 0x966   :  { %3340 = vmatprep.mubr.msk.bf16.mxu1 %vm3677_vm0, %v3676_v2 }
 0xa25   :  { %v1464_v27 = vpop.f32.mrf.mxu1 }
 0xa26   :  { %v1471_v17 = vadd.f32 %v1464_v27, %v4051_v14 }
 0xa27   :  { %v3310_v28 = vpop.f32.mrf.mxu1 }
 0xa28   :  { %v4129_v22 = vadd.f32 %v1476_v23, %v1471_v17 }
 0xa29   :  { %v1467_v29 = vpop.f32.mrf.mxu1 }
 0xa2a   :  { %v1472_v24 = vadd.f32 %v1467_v29, %v4058_v25  ;;  %v1515_v10 = vsel %vm174_vm4, %v4129_v22, 0.0  ;;  %v1523_v31 = vmul.f32 %v4129_v22, %v4129_v22 }
 0xa2b   :  { %1516 = vadd.xlane.f32.xlu1 %v1515_v10  ;;  %v3311_v30 = vpop.f32.mrf.mxu1 }
 0xa2c   :  { %v4136_v26 = vadd.f32 %v1476_v23, %v1472_v24  ;;  %v1525_v47 = vsel %vm174_vm4, %v1523_v31, 0.0 }
 0xa2e   :  { %v1518_v14 = vsel %vm174_vm4, %v4136_v26, 0.0  ;;  %v1524_v32 = vmul.f32 %v4136_v26, %v4136_v26 }
 0xa2f   :  { %1526 = vadd.xlane.f32.xlu1 %v1525_v47  ;;  %1519 = vadd.xlane.f32.xlu0 %v1518_v14 }
 0xa30   :  { %v1528_v25 = vsel %vm174_vm4, %v1524_v32, 0.0 }
 0xa33   :  { %1529 = vadd.xlane.f32.xlu0 %v1528_v25 }
 0xab4   :  { %v1517_v35 = vpop.xlane.xlu1 %1516 }
 0xab5   :  { %v1521_v36 = vmul.f32 0.03125, %v1517_v35 }
 0xab7   :  { %v1533_v39 = vmul.f32 %v1521_v36, %v1521_v36  ;;  %v1537_v57 = vsub.f32 %v4129_v22, %v1521_v36 }
 0xab8   :  { %v1527_v37 = vpop.xlane.xlu1 %1526  ;;  %v1520_v38 = vpop.xlane.xlu0 %1519 }
 0xab9   :  { %v1531_v40 = vmul.f32 0.03125, %v1527_v37  ;;  %v1522_v41 = vmul.f32 0.03125, %v1520_v38 }
 0xabb   :  { %v1535_v42 = vsub.f32 %v1531_v40, %v1533_v39  ;;  %v1534_v50 = vmul.f32 %v1522_v41, %v1522_v41  ;;  %v1538_v9 = vsub.f32 %v4136_v26, %v1522_v41 }
 0xabc   :  { %v1530_v43 = vpop.xlane.xlu0 %1529 }
 0xabd   :  { %v1539_v48 = vadd.f32 1e-05, %v1535_v42  ;;  %v1532_v52 = vmul.f32 0.03125, %v1530_v43 }
 0xabf   :  { %3609 = vrsqrt.f32 %v1539_v48  ;;  %v1536_v54 = vsub.f32 %v1532_v52, %v1534_v50 }
 0xac1   :  { %v1540_v55 = vadd.f32 1e-05, %v1536_v54 }
 0xac3   :  { %3611 = vrsqrt.f32 %v1540_v55 }
 0xacc   :  { %v3610_v11 = vpop.eup %3609 }
 0xacd   :  { %v1543_v13 = vmul.f32 %v3610_v11, %v1537_v57 }
 0xacf   :  { %v1549_v60 = vmul.f32 %v1548_v56, %v1543_v13 }
 0xad0   :  { %v3612_v49 = vpop.eup %3611 }
 0xad1   :  { %v1544_v59 = vmul.f32 %v3612_v49, %v1538_v9  ;;  %v1555_v0 = vadd.f32 %v1554_v62, %v1549_v60 }
 0xad3   :  { %v1550_v63 = vmul.f32 %v1548_v56, %v1544_v59 }
 0xad5   :  { %v1556_v1 = vadd.f32 %v1554_v62, %v1550_v63 }
 0xad7   :  { %v1557_v4 = vpack.c.bf16 %v1556_v1, %v1555_v0 }
 0xad9   :  { %3317 = vmatmul.mubr.msk.bf16.vlgmr.msra.gmra.mxu0 %vm174_vm4, %v1557_v4 }
 0xada   :  { %3322 = vmatprep.mubr.msk.bf16.mxu0 %vm3677_vm0, %v3676_v2 }
 0xb99   :  { %v1607_v19 = vpop.f32.mrf.mxu0 }
 0xb9a   :  { %v1634_v12 = vpack.c.bf16 %v1607_v19, %v1607_v19 }
 0xb9b   :  { %v3318_v5 = vpop.f32.mrf.mxu0 }
 0xb9d   :  { %v1610_v61 = vpop.f32.mrf.mxu0 }
 0xb9e   :  { %v3510_v6 = vpack.i.bf16 %v1610_v61, %v1607_v19  ;;  %v1635_v8 = vpack.c.bf16 %v1610_v61, %v1610_v61 }
 0xb9f   :  { %v3319_v7 = vpop.f32.mrf.mxu0 }
 0xba0   :  { %3511 = vrot.lane.b32.xlu0 %v3510_v6, %s3680_s22  ;;  %3506 = vrot.lane.b32.xlu1 %v3510_v6, %s3678_s20 }
 0xba4   :  { %3516 = vrot.lane.b32.xlu1 %v3510_v6, %s3681_s23  ;;  %1692 = vrot.lane.b32.xlu0 %v1635_v8, %s3679_s21 }
 0xba8   :  { %1643 = vrot.lane.b32.xlu1 %v1634_v12, %s3679_s21 }
 0xc12   :  { %v3512_v15 = vpop.permute.xlu0 %3511  ;;  %v3507_v16 = vpop.permute.xlu1 %3506 }
 0xc13   :  { %v3509_v18 = vunpack.i.h.bf16 %v3507_v16  ;;  %v3508_v23 = vunpack.i.l.bf16 %v3507_v16  ;;  %v3514_v27 = vunpack.i.h.bf16 %v3512_v15  ;;  %v3513_v17 = vunpack.i.l.bf16 %v3512_v15 }
 0xc15   :  { %v4171_v28 = vpack.c.bf16 %v3509_v18, %v3509_v18  ;;  %v4173_v29 = vpack.c.bf16 %v3508_v23, %v3508_v23  ;;  %v4179_v10 = vpack.c.bf16 %v3514_v27, %v3514_v27  ;;  %v4181_v31 = vpack.c.bf16 %v3513_v17, %v3513_v17 }
 0xc16   :  { %v3517_v24 = vpop.permute.xlu1 %3516  ;;  %v1693_v34 = vpop.permute.xlu0 %1692 }
 0xc17   :  { %1741 = vrot.lane.b32.xlu1 %v4173_v29, %s3679_s21  ;;  %1790 = vrot.lane.b32.xlu0 %v4171_v28, %s3679_s21  ;;  %v3519_v30 = vunpack.i.h.bf16 %v3517_v24  ;;  %v3518_v47 = vunpack.i.l.bf16 %v3517_v24  ;;  %v1698_v35 = vsel %vm306_vm5, %v1693_v34, 0 }
 0xc19   :  { %v4188_v25 = vpack.c.bf16 %v3519_v30, %v3519_v30  ;;  %v4190_v33 = vpack.c.bf16 %v3518_v47, %v3518_v47 }
 0xc1a   :  { %v1644_v14 = vpop.permute.xlu1 %1643 }
 0xc1b   :  { %v1649_v32 = vsel %vm306_vm5, %v1644_v14, 0  ;;  %1839 = vrot.lane.b32.xlu1 %v4181_v31, %s3679_s21  ;;  %1888 = vrot.lane.b32.xlu0 %v4179_v10, %s3679_s21 }
 0xc1c   :  { %3321 = vmatpush3.bf16.xpose.msra.mxu0 %v1649_v32 }
 0xc1d   :  { %3326 = vmatprep.subr.bf16.mxu0 %v3676_v2 }
 0xc1f   :  { %1937 = vrot.lane.b32.xlu1 %v4190_v33, %s3679_s21  ;;  %1986 = vrot.lane.b32.xlu0 %v4188_v25, %s3679_s21 }
 0xc23   :  { %3323 = vmatmul.mubr.msk.bf16.vlgmr.msra.gmra.mxu0 %vm306_vm5, %v1634_v12  ;;  %2178 = vrot.lane.b32.xlu1 %v1635_v8, %s3682_s24 }
 0xc24   :  { %2130 = vrot.lane.b32.xlu0 %v1634_v12, %s3682_s24  ;;  %3327 = vmatpush3.bf16.xpose.msra.mxu0 %v1698_v35 }
 0xc25   :  { %3328 = vmatprep.mubr.msk.bf16.mxu0 %vm3677_vm0, %v3676_v2  ;;  %3332 = vmatprep.subr.bf16.mxu0 %v3676_v2 }
 0xc2b   :  { %3329 = vmatmul.mubr.msk.bf16.vlgmr.msra.gmra.mxu0 %vm306_vm5, %v1635_v8 }
 0xc2c   :  { %3334 = vmatprep.mubr.msk.bf16.mxu0 %vm3677_vm0, %v3676_v2 }
 0xc89   :  { %v1742_v36 = vpop.permute.xlu1 %1741  ;;  %v1791_v37 = vpop.permute.xlu0 %1790 }
 0xc8a   :  { %v1747_v38 = vsel %vm306_vm5, %v1742_v36, 0  ;;  %v1796_v39 = vsel %vm306_vm5, %v1791_v37, 0 }
 0xc8b   :  { %3333 = vmatpush3.bf16.xpose.msra.mxu0 %v1747_v38  ;;  %3339 = vmatpush3.bf16.xpose.msra.mxu1 %v1796_v39 }
 0xc8c   :  { %3344 = vmatprep.subr.bf16.mxu0 %v3676_v2  ;;  %3350 = vmatprep.subr.bf16.mxu1 %v3676_v2 }
 0xc8d   :  { %v1840_v40 = vpop.permute.xlu1 %1839  ;;  %v1889_v41 = vpop.permute.xlu0 %1888 }
 0xc8e   :  { %v1845_v42 = vsel %vm306_vm5, %v1840_v40, 0  ;;  %v1894_v43 = vsel %vm306_vm5, %v1889_v41, 0 }
 0xc91   :  { %v1938_v48 = vpop.permute.xlu1 %1937  ;;  %v1987_v50 = vpop.permute.xlu0 %1986 }
 0xc92   :  { %3335 = vmatmul.mubr.msk.bf16.vlgmr.msra.gmra.mxu0 %vm306_vm5, %v4173_v29  ;;  %3341 = vmatmul.mubr.msk.bf16.vlgmr.msra.gmra.mxu1 %vm306_vm5, %v4171_v28  ;;  %v1943_v52 = vsel %vm306_vm5, %v1938_v48, 0  ;;  %v1992_v54 = vsel %vm306_vm5, %v1987_v50, 0 }
 0xc93   :  { %3345 = vmatpush3.bf16.xpose.msra.mxu0 %v1845_v42  ;;  %3351 = vmatpush3.bf16.xpose.msra.mxu1 %v1894_v43 }
 0xc94   :  { %3346 = vmatprep.mubr.msk.bf16.mxu0 %vm3677_vm0, %v3676_v2  ;;  %3352 = vmatprep.mubr.msk.bf16.mxu1 %vm3677_vm0, %v3676_v2 }
 0xc95   :  { %3356 = vmatprep.subr.bf16.mxu0 %v3676_v2  ;;  %3362 = vmatprep.subr.bf16.mxu1 %v3676_v2  ;;  %v2179_v55 = vpop.permute.xlu1 %2178 }
 0xc96   :  { %v2131_v57 = vpop.permute.xlu0 %2130  ;;  %v2184_v11 = vsel %vm797_vm6, %v2179_v55, 0 }
 0xc97   :  { %v2136_v13 = vsel %vm797_vm6, %v2131_v57, 0 }
 0xc9a   :  { %3347 = vmatmul.mubr.msk.bf16.vlgmr.msra.gmra.mxu0 %vm306_vm5, %v4181_v31  ;;  %3353 = vmatmul.mubr.msk.bf16.vlgmr.msra.gmra.mxu1 %vm306_vm5, %v4179_v10 }
 0xc9b   :  { %3357 = vmatpush3.bf16.xpose.msra.mxu0 %v1943_v52  ;;  %3363 = vmatpush3.bf16.xpose.msra.mxu1 %v1992_v54 }
 0xc9c   :  { %3358 = vmatprep.mubr.msk.bf16.mxu0 %vm3677_vm0, %v3676_v2  ;;  %3364 = vmatprep.mubr.msk.bf16.mxu1 %vm3677_vm0, %v3676_v2 }
 0xc9d   :  { %3368 = vmatprep.subr.bf16.mxu0 %v3676_v2  ;;  %3374 = vmatprep.subr.bf16.mxu1 %v3676_v2 }
 0xca2   :  { %3359 = vmatmul.mubr.msk.bf16.vlgmr.msra.gmra.mxu0 %vm306_vm5, %v4190_v33  ;;  %3365 = vmatmul.mubr.msk.bf16.vlgmr.msra.gmra.mxu1 %vm306_vm5, %v4188_v25 }
 0xca3   :  { %3369 = vmatpush3.bf16.msra.mxu0 %v2136_v13  ;;  %3375 = vmatpush3.bf16.msra.mxu1 %v2184_v11 }
 0xca4   :  { %3370 = vmatprep.mubr.msk.bf16.mxu0 %vm3677_vm0, %v3676_v2  ;;  %3376 = vmatprep.mubr.msk.bf16.mxu1 %vm3677_vm0, %v3676_v2 }
 0xca5   :  { %3380 = vmatprep.subr.bf16.mxu0 %v3676_v2  ;;  %3386 = vmatprep.subr.bf16.mxu1 %v3676_v2 }
 0xce3   :  { %v1685_v56 = vpop.f32.mrf.mxu0 }
 0xce4   :  { %v1686_v9 = vadd.f32 %v1685_v56, %v3920_v46 }
 0xce5   :  { %v3324_v49 = vpop.f32.mrf.mxu0 }
 0xce6   :  { %v2034_v59 = vsel %vm306_vm5, %v1686_v9, -inf }
 0xce7   :  { %2035 = vmax.xlane.f32.xlu1 %v2034_v59  ;;  %v1688_v60 = vpop.f32.mrf.mxu0 }
 0xce9   :  { %v3325_v62 = vpop.f32.mrf.mxu0 }
 0xceb   :  { %v1734_v63 = vpop.f32.mrf.mxu0 }
 0xcec   :  { %v1735_v0 = vadd.f32 %v1734_v63, %v3920_v46 }
 0xced   :  { %v3330_v1 = vpop.f32.mrf.mxu0 }
 0xcee   :  { %v2037_v4 = vsel %vm306_vm5, %v1735_v0, -inf }
 0xcef   :  { %2038 = vmax.xlane.f32.xlu0 %v2037_v4  ;;  %v1737_v19 = vpop.f32.mrf.mxu0 }
 0xcf1   :  { %v3331_v5 = vpop.f32.mrf.mxu0 }
 0xd52   :  { %v1783_v61 = vpop.f32.mrf.mxu0  ;;  %v1832_v6 = vpop.f32.mrf.mxu1 }
 0xd53   :  { %v1784_v7 = vadd.f32 %v1783_v61, %v3920_v46  ;;  %v1833_v8 = vadd.f32 %v1832_v6, %v3920_v46 }
 0xd54   :  { %v3336_v12 = vpop.f32.mrf.mxu0  ;;  %v3342_v15 = vpop.f32.mrf.mxu1 }
 0xd55   :  { %v2040_v16 = vsel %vm306_vm5, %v1784_v7, -inf  ;;  %v2043_v18 = vsel %vm306_vm5, %v1833_v8, -inf }
 0xd56   :  { %2041 = vmax.xlane.f32.xlu0 %v2040_v16  ;;  %v1786_v23 = vpop.f32.mrf.mxu0  ;;  %2044 = vmax.xlane.f32.xlu1 %v2043_v18  ;;  %v1835_v27 = vpop.f32.mrf.mxu1 }
 0xd58   :  { %v3337_v17 = vpop.f32.mrf.mxu0  ;;  %v3343_v24 = vpop.f32.mrf.mxu1 }
 0xd5a   :  { %v1881_v30 = vpop.f32.mrf.mxu0  ;;  %v1930_v47 = vpop.f32.mrf.mxu1 }
 0xd5b   :  { %v4256_v14 = vadd.f32 %v1881_v30, %v3920_v46  ;;  %v1931_v32 = vadd.f32 %v1930_v47, %v3920_v46 }
 0xd5c   :  { %v3348_v34 = vpop.f32.mrf.mxu0  ;;  %v3354_v35 = vpop.f32.mrf.mxu1 }
 0xd5d   :  { %v2046_v36 = vsel %vm306_vm5, %v4256_v14, -inf  ;;  %v2049_v37 = vsel %vm306_vm5, %v1931_v32, -inf }
 0xd5e   :  { %2047 = vmax.xlane.f32.xlu0 %v2046_v36  ;;  %v1884_v38 = vpop.f32.mrf.mxu0  ;;  %2050 = vmax.xlane.f32.xlu1 %v2049_v37  ;;  %v1933_v39 = vpop.f32.mrf.mxu1 }
 0xd60   :  { %v3349_v40 = vpop.f32.mrf.mxu0  ;;  %v3355_v41 = vpop.f32.mrf.mxu1 }
 0xd62   :  { %v1979_v42 = vpop.f32.mrf.mxu0  ;;  %v2028_v43 = vpop.f32.mrf.mxu1 }
 0xd63   :  { %v4263_v48 = vadd.f32 %v1979_v42, %v3920_v46  ;;  %v2029_v50 = vadd.f32 %v2028_v43, %v3920_v46 }
 0xd64   :  { %v3360_v52 = vpop.f32.mrf.mxu0  ;;  %v3366_v54 = vpop.f32.mrf.mxu1 }
 0xd65   :  { %v2052_v55 = vsel %vm306_vm5, %v4263_v48, -inf  ;;  %v2055_v57 = vsel %vm306_vm5, %v2029_v50, -inf }
 0xd66   :  { %2053 = vmax.xlane.f32.xlu0 %v2052_v55  ;;  %v1982_v11 = vpop.f32.mrf.mxu0  ;;  %2056 = vmax.xlane.f32.xlu1 %v2055_v57  ;;  %v2031_v13 = vpop.f32.mrf.mxu1 }
 0xd68   :  { %v3361_v56 = vpop.f32.mrf.mxu0  ;;  %v3367_v49 = vpop.f32.mrf.mxu1 }
 0xd70   :  { %v2036_v46 = vpop.xlane.xlu1 %2035 }
 0xd71   :  { %v2058_v60 = vsub.f32 %v1686_v9, %v2036_v46 }
 0xd73   :  { %v2066_v63 = vmul.f32 1.442695, %v2058_v60 }
 0xd75   :  { %3613 = vpow2.f32 %v2066_v63 }
 0xd77   :  { %2226 = vrot.lane.b32.xlu1 %v4173_v29, %s3682_s24 }
 0xd78   :  { %v2039_v59 = vpop.xlane.xlu0 %2038 }
 0xd79   :  { %v2059_v62 = vsub.f32 %v1735_v0, %v2039_v59 }
 0xd7b   :  { %v2068_v1 = vmul.f32 1.442695, %v2059_v62 }
 0xd7c   :  { %2274 = vrot.lane.b32.xlu0 %v4171_v28, %s3682_s24 }
 0xd7d   :  { %3615 = vpow2.f32 %v2068_v1 }
 0xd82   :  { %v3614_v4 = vpop.eup %3613 }
 0xd83   :  { %v2082_v5 = vsel %vm306_vm5, %v3614_v4, 0.0 }
 0xd8a   :  { %v3616_v19 = vpop.eup %3615 }
 0xd8b   :  { %v2085_v61 = vsel %vm306_vm5, %v3616_v19, 0.0 }
 0xd9b   :  { %2083 = vadd.xlane.f32.xlu0 %v2082_v5  ;;  %2086 = vadd.xlane.f32.xlu1 %v2085_v61 }
 0xdac   :  { %2322 = vrot.lane.b32.xlu1 %v4181_v31, %s3682_s24 }
 0xddf   :  { %v2042_v28 = vpop.xlane.xlu0 %2041  ;;  %v2045_v29 = vpop.xlane.xlu1 %2044 }
 0xde0   :  { %v2060_v6 = vsub.f32 %v1784_v7, %v2042_v28  ;;  %v2061_v9 = vsub.f32 %v1833_v8, %v2045_v29 }
 0xde2   :  { %v2070_v0 = vmul.f32 1.442695, %v2060_v6  ;;  %v2072_v12 = vmul.f32 1.442695, %v2061_v9 }
 0xde4   :  { %3617 = vpow2.f32 %v2070_v0 }
 0xde5   :  { %3619 = vpow2.f32 %v2072_v12 }
 0xde7   :  { %v2051_v15 = vpop.xlane.xlu1 %2050  ;;  %v2048_v35 = vpop.xlane.xlu0 %2047 }
 0xde8   :  { %v2063_v16 = vsub.f32 %v1931_v32, %v2051_v15  ;;  %v2062_v36 = vsub.f32 %v4256_v14, %v2048_v35 }
 0xdea   :  { %v2076_v18 = vmul.f32 1.442695, %v2063_v16  ;;  %v2074_v38 = vmul.f32 1.442695, %v2062_v36 }
 0xdec   :  { %3621 = vpow2.f32 %v2076_v18 }
 0xdef   :  { %v2057_v23 = vpop.xlane.xlu1 %2056  ;;  %v2054_v37 = vpop.xlane.xlu0 %2053 }
 0xdf0   :  { %v2065_v27 = vsub.f32 %v2029_v50, %v2057_v23  ;;  %v2064_v39 = vsub.f32 %v4263_v48, %v2054_v37 }
 0xdf1   :  { %v3618_v17 = vpop.eup %3617 }
 0xdf2   :  { %v3620_v24 = vpop.eup %3619  ;;  %v2080_v30 = vmul.f32 1.442695, %v2065_v27  ;;  %v2088_v47 = vsel %vm306_vm5, %v3618_v17, 0.0  ;;  %v2078_v40 = vmul.f32 1.442695, %v2064_v39 }
 0xdf3   :  { %2089 = vadd.xlane.f32.xlu0 %v2088_v47  ;;  %v2091_v31 = vsel %vm306_vm5, %v3620_v24, 0.0  ;;  %v2275_v41 = vpop.permute.xlu0 %2274  ;;  %v2227_v42 = vpop.permute.xlu1 %2226 }
 0xdf4   :  { %2092 = vadd.xlane.f32.xlu1 %v2091_v31  ;;  %3623 = vpow2.f32 %v2080_v30  ;;  %v2232_v56 = vsel %vm797_vm6, %v2227_v42, 0  ;;  %v2280_v49 = vsel %vm797_vm6, %v2275_v41, 0 }
 0xdf5   :  { %3625 = vpow2.f32 %v2074_v38 }
 0xdf6   :  { %3627 = vpow2.f32 %v2078_v40 }
 0xdf9   :  { %v4279_v7 = vpop.eup %3621 }
 0xdfa   :  { %v2097_v8 = vsel %vm306_vm5, %v4279_v7, 0.0 }
 0xdfb   :  { %2098 = vadd.xlane.f32.xlu1 %v2097_v8 }
 0xe01   :  { %v4283_v32 = vpop.eup %3623 }
 0xe02   :  { %v2103_v34 = vsel %vm306_vm5, %v4283_v32, 0.0  ;;  %v4293_v43 = vpop.eup %3625 }
 0xe03   :  { %2104 = vadd.xlane.f32.xlu1 %v2103_v34  ;;  %v4297_v14 = vpop.eup %3627 }
 0xe09   :  { %2370 = vrot.lane.b32.xlu0 %v4179_v10, %s3682_s24  ;;  %v2094_v10 = vsel %vm306_vm5, %v4293_v43, 0.0 }
 0xe14   :  { %2418 = vrot.lane.b32.xlu1 %v4190_v33, %s3682_s24  ;;  %v2100_v33 = vsel %vm306_vm5, %v4297_v14, 0.0 }
 0xe24   :  { %v2084_v50 = vpop.xlane.xlu0 %2083  ;;  %v2087_v52 = vpop.xlane.xlu1 %2086 }
 0xe25   :  { %3629 = vrcp.f32 %v2084_v50 }
 0xe26   :  { %3631 = vrcp.f32 %v2087_v52 }
 0xe28   :  { %2095 = vadd.xlane.f32.xlu0 %v2094_v10  ;;  %v2323_v46 = vpop.permute.xlu1 %2322 }
 0xe29   :  { %v2328_v29 = vsel %vm797_vm6, %v2323_v46, 0  ;;  %v3555_v46 = vld [vmem:[%s4468_s4 + $0x18] sm:$0xff]  }
 0xe2c   :  { %2101 = vadd.xlane.f32.xlu0 %v2100_v33 }
 0xe32   :  { %v3630_v48 = vpop.eup %3629 }
 0xe33   :  { %v3632_v54 = vpop.eup %3631  ;;  %v2114_v55 = vmul.f32 %v3630_v48, %v3614_v4 }
 0xe34   :  { %v2115_v57 = vmul.f32 %v3632_v54, %v3616_v19 }
 0xe35   :  { %v2122_v11 = vpack.c.bf16 %v2114_v55, %v2114_v55 }
 0xe36   :  { %v2123_v13 = vpack.c.bf16 %v2115_v57, %v2115_v57 }
 0xe37   :  { %3371 = vmatmul.mubr.msk.bf16.vlgmr.msra.gmra.mxu0 %vm306_vm5, %v2122_v11 }
 0xe38   :  { %3377 = vmatmul.mubr.msk.bf16.vlgmr.msra.gmra.mxu1 %vm306_vm5, %v2123_v13  ;;  %3381 = vmatpush3.bf16.msra.mxu0 %v2232_v56 }
 0xe39   :  { %3387 = vmatpush3.bf16.msra.mxu1 %v2280_v49  ;;  %3382 = vmatprep.mubr.msk.bf16.mxu0 %vm3677_vm0, %v3676_v2 }
 0xe3a   :  { %3388 = vmatprep.mubr.msk.bf16.mxu1 %vm3677_vm0, %v3676_v2  ;;  %3392 = vmatprep.subr.bf16.mxu0 %v3676_v2 }
 0xe3b   :  { %3398 = vmatprep.subr.bf16.mxu1 %v3676_v2 }
 0xe42   :  { %2466 = vrot.lane.b32.xlu0 %v4188_v25, %s3682_s24 }
 0xe7c   :  { %v2090_v59 = vpop.xlane.xlu0 %2089 }
 0xe7d   :  { %3633 = vrcp.f32 %v2090_v59  ;;  %v2093_v60 = vpop.xlane.xlu1 %2092 }
 0xe7e   :  { %3635 = vrcp.f32 %v2093_v60 }
 0xe80   :  { %v2371_v5 = vpop.permute.xlu0 %2370 }
 0xe81   :  { %v2376_v25 = vsel %vm797_vm6, %v2371_v5, 0 }
 0xe84   :  { %v2099_v62 = vpop.xlane.xlu1 %2098 }
 0xe85   :  { %3637 = vrcp.f32 %v2099_v62 }
 0xe8a   :  { %v3634_v63 = vpop.eup %3633 }
 0xe8b   :  { %v3636_v1 = vpop.eup %3635  ;;  %v2116_v4 = vmul.f32 %v3634_v63, %v3618_v17 }
 0xe8c   :  { %v2117_v19 = vmul.f32 %v3636_v1, %v3620_v24  ;;  %v2105_v12 = vpop.xlane.xlu1 %2104 }
 0xe8d   :  { %v2124_v61 = vpack.c.bf16 %v2116_v4, %v2116_v4  ;;  %3639 = vrcp.f32 %v2105_v12  ;;  %v3556_v4 = vld [vmem:[%s4468_s4 + $0x10] sm:$0xff]  }
 0xe8e   :  { %v2125_v28 = vpack.c.bf16 %v2117_v19, %v2117_v19 }
 0xe8f   :  { %3383 = vmatmul.mubr.msk.bf16.vlgmr.msra.gmra.mxu0 %vm306_vm5, %v2124_v61 }
 0xe90   :  { %3389 = vmatmul.mubr.msk.bf16.vlgmr.msra.gmra.mxu1 %vm306_vm5, %v2125_v28  ;;  %3393 = vmatpush3.bf16.msra.mxu0 %v2328_v29  ;;  %v2419_v31 = vpop.permute.xlu1 %2418 }
 0xe91   :  { %3399 = vmatpush3.bf16.msra.mxu1 %v2376_v25  ;;  %3400 = vmatprep.mubr.msk.bf16.mxu1 %vm3677_vm0, %v3676_v2 }
 0xe92   :  { %3410 = vmatprep.subr.bf16.mxu1 %v3676_v2  ;;  %3394 = vmatprep.mubr.msk.bf16.mxu0 %vm3677_vm0, %v3676_v2  ;;  %v3638_v6 = vpop.eup %3637 }
 0xe93   :  { %3404 = vmatprep.subr.bf16.mxu0 %v3676_v2  ;;  %v2119_v9 = vmul.f32 %v3638_v6, %v4279_v7 }
 0xe95   :  { %v2127_v0 = vpack.c.bf16 %v2119_v9, %v2119_v9 }
 0xe98   :  { %3401 = vmatmul.mubr.msk.bf16.vlgmr.msra.gmra.mxu1 %vm306_vm5, %v2127_v0 }
 0xe99   :  { %3412 = vmatprep.mubr.msk.bf16.mxu1 %vm3677_vm0, %v3676_v2 }
 0xe9a   :  { %v3640_v16 = vpop.eup %3639 }
 0xe9b   :  { %v2121_v23 = vmul.f32 %v3640_v16, %v4283_v32  ;;  %v2424_v32 = vsel %vm797_vm6, %v2419_v31, 0 }
 0xe9d   :  { %v2129_v24 = vpack.c.bf16 %v2121_v23, %v2121_v23 }
 0xeb1   :  { %v2096_v15 = vpop.xlane.xlu0 %2095 }
 0xeb2   :  { %3641 = vrcp.f32 %v2096_v15 }
 0xeb5   :  { %v2102_v18 = vpop.xlane.xlu0 %2101 }
 0xeb6   :  { %3643 = vrcp.f32 %v2102_v18 }
 0xeb9   :  { %v2467_v27 = vpop.permute.xlu0 %2466 }
 0xeba   :  { %v2472_v17 = vsel %vm797_vm6, %v2467_v27, 0 }
 0xebb   :  { %3411 = vmatpush3.bf16.msra.mxu1 %v2472_v17 }
 0xebc   :  { %3424 = vmatprep.subr.bf16.mxu1 %v3676_v2 }
 0xebe   :  { %3413 = vmatmul.mubr.msk.bf16.vlgmr.msra.gmra.mxu1 %vm306_vm5, %v2129_v24 }
 0xebf   :  { %v3642_v30 = vpop.eup %3641  ;;  %3428 = vmatprep.mubr.msk.bf16.mxu1 %vm3677_vm0, %v3676_v2 }
 0xec0   :  { %v2118_v47 = vmul.f32 %v3642_v30, %v4293_v43 }
 0xec2   :  { %v2126_v7 = vpack.c.bf16 %v2118_v47, %v2118_v47 }
 0xec3   :  { %v3644_v8 = vpop.eup %3643 }
 0xec4   :  { %3395 = vmatmul.mubr.msk.bf16.vlgmr.msra.gmra.mxu0 %vm306_vm5, %v2126_v7  ;;  %v2120_v34 = vmul.f32 %v3644_v8, %v4297_v14 }
 0xec5   :  { %3405 = vmatpush3.bf16.msra.mxu0 %v2424_v32  ;;  %3406 = vmatprep.mubr.msk.bf16.mxu0 %vm3677_vm0, %v3676_v2 }
 0xec6   :  { %3416 = vmatprep.subr.bf16.mxu0 %v3676_v2  ;;  %v2128_v35 = vpack.c.bf16 %v2120_v34, %v2120_v34 }
 0xecc   :  { %3407 = vmatmul.mubr.msk.bf16.vlgmr.msra.gmra.mxu0 %vm306_vm5, %v2128_v35 }
 0xecd   :  { %3420 = vmatprep.mubr.msk.bf16.mxu0 %vm3677_vm0, %v3676_v2  ;;  %3417 = vmatpush3.bf16.msra.mxu0 %v3555_v46 }
 0xece   :  { %3418 = vmatprep.subr.bf16.mxu0 %v3676_v2 }
 0xed1   :  { %3419 = vmatpush3.bf16.msra.mxu0 %v3556_v4 }
 0xed2   :  { %3432 = vmatprep.subr.bf16.mxu0 %v3676_v2 }
 0xef7   :  { %v2172_v36 = vpop.f32.mrf.mxu0 }
 0xef8   :  { %v2220_v37 = vpop.f32.mrf.mxu1 }
 0xef9   :  { %v3372_v38 = vpop.f32.mrf.mxu0 }
 0xefa   :  { %v3378_v39 = vpop.f32.mrf.mxu1 }
 0xefb   :  { %v2175_v40 = vpop.f32.mrf.mxu0 }
 0xefc   :  { %v2223_v41 = vpop.f32.mrf.mxu1 }
 0xefd   :  { %v3373_v42 = vpop.f32.mrf.mxu0 }
 0xefe   :  { %v3379_v43 = vpop.f32.mrf.mxu1 }
 0xf4f   :  { %v2268_v50 = vpop.f32.mrf.mxu0 }
 0xf50   :  { %v2316_v52 = vpop.f32.mrf.mxu1 }
 0xf51   :  { %v3520_v10 = vpack.i.bf16 %v2316_v52, %v2268_v50  ;;  %v3384_v14 = vpop.f32.mrf.mxu0 }
 0xf52   :  { %v3390_v33 = vpop.f32.mrf.mxu1 }
 0xf53   :  { %3521 = vrot.lane.b32.xlu1 %v3520_v10, %s3684_s25  ;;  %v2271_v48 = vpop.f32.mrf.mxu0  ;;  %v3557_v33 = vld [vmem:[%s4469_s5 + $0x18] sm:$0xff]  }
 0xf54   :  { %v2319_v54 = vpop.f32.mrf.mxu1  ;;  %3425 = vmatpush3.bf16.msra.mxu1 %v3557_v33  ;;  %v3558_v48 = vld [vmem:[%s4469_s5 + $0x10] sm:$0xff]  }
 0xf55   :  { %v3385_v55 = vpop.f32.mrf.mxu0  ;;  %3426 = vmatprep.subr.bf16.mxu1 %v3676_v2  ;;  %v3559_v54 = vld [vmem:[%s4470_s6 + $0x78] sm:$0xff]  }
 0xf56   :  { %v3391_v57 = vpop.f32.mrf.mxu1  ;;  %v3560_v55 = vld [vmem:[%s4470_s6 + $0x70] sm:$0xff]  }
 0xf57   :  { %v3561_v57 = vld [vmem:[%s4470_s6 + $0x68] sm:$0xff]  }
 0xf58   :  { %v2412_v11 = vpop.f32.mrf.mxu1  ;;  %3427 = vmatpush3.bf16.msra.mxu1 %v3558_v48 }
 0xf59   :  { %3452 = vmatprep.subr.bf16.mxu1 %v3676_v2 }
 0xf5a   :  { %v3402_v13 = vpop.f32.mrf.mxu1 }
 0xf5b   :  { %v3563_v13 = vld [vmem:[%s4470_s6 + $0x58] sm:$0xff]  }
 0xf5c   :  { %v2415_v56 = vpop.f32.mrf.mxu1 }
 0xf5e   :  { %v3403_v49 = vpop.f32.mrf.mxu1 }
 0xf7e   :  { %v2508_v59 = vpop.f32.mrf.mxu1 }
 0xf80   :  { %v3414_v60 = vpop.f32.mrf.mxu1 }
 0xf82   :  { %v2511_v62 = vpop.f32.mrf.mxu1 }
 0xf84   :  { %v2364_v63 = vpop.f32.mrf.mxu0  ;;  %v3415_v1 = vpop.f32.mrf.mxu1 }
 0xf85   :  { %v3525_v19 = vpack.i.bf16 %v2412_v11, %v2364_v63  ;;  %v3562_v11 = vld [vmem:[%s4470_s6 + $0x60] sm:$0xff]  }
 0xf86   :  { %v3396_v5 = vpop.f32.mrf.mxu0 }
 0xf87   :  { %3526 = vrot.lane.b32.xlu0 %v3525_v19, %s3685_s30 }
 0xf88   :  { %v2367_v61 = vpop.f32.mrf.mxu0 }
 0xf8a   :  { %v3397_v28 = vpop.f32.mrf.mxu0 }
 0xf8c   :  { %v2460_v29 = vpop.f32.mrf.mxu0 }
 0xf8d   :  { %v3530_v25 = vpack.i.bf16 %v2508_v59, %v2460_v29 }
 0xf8e   :  { %v3408_v6 = vpop.f32.mrf.mxu0 }
 0xf8f   :  { %3531 = vrot.lane.b32.xlu1 %v3530_v25, %s3686_s0 }
 0xf90   :  { %v2463_v9 = vpop.f32.mrf.mxu0 }
 0xf92   :  { %v3409_v0 = vpop.f32.mrf.mxu0 }
 0xf93   :  { %v2642_v0 = vrot.slane %v4155_v20, %v1306_v53  ;;  %v3564_v53 = vld [vmem:[%s4470_s6 + $0x50] sm:$0xff]  }
 0xfc5   :  { %v3522_v12 = vpop.permute.xlu1 %3521 }
 0xfc6   :  { %v3524_v16 = vunpack.i.h.bf16 %v3522_v12  ;;  %v3523_v18 = vunpack.i.l.bf16 %v3522_v12 }
 0xfc8   :  { %v2539_v24 = vsel %vm306_vm5, %v2220_v37, %v3524_v16  ;;  %v2538_v30 = vsel %vm306_vm5, %v2172_v36, %v3523_v18  ;;  %v2606_v36 = vrot.slane %v4155_v20, %v1270_v3 }
 0xff9   :  { %v3527_v15 = vpop.permute.xlu0 %3526 }
 0xffa   :  { %v3529_v23 = vunpack.i.h.bf16 %v3527_v15  ;;  %v3528_v27 = vunpack.i.l.bf16 %v3527_v15 }
 0xffc   :  { %v2541_v7 = vsel %vm1203_vm8, %v2539_v24, %v3529_v23  ;;  %v2540_v8 = vsel %vm1203_vm8, %v2538_v30, %v3528_v27  ;;  %v2648_v23 = vrot.slane %v4155_v20, %v1312_v58  ;;  %v3565_v58 = vld [vmem:[%s4470_s6 + $0x48] sm:$0xff]  }
0x1001   :  { %v3532_v17 = vpop.permute.xlu1 %3531 }
0x1002   :  { %v3534_v47 = vunpack.i.h.bf16 %v3532_v17  ;;  %v3533_v31 = vunpack.i.l.bf16 %v3532_v17 }
0x1004   :  { %v2543_v32 = vsel %vm1206_vm9, %v2541_v7, %v3534_v47  ;;  %v2542_v34 = vsel %vm1206_vm9, %v2540_v8, %v3533_v31  ;;  %v3566_v47 = vld [vmem:[%s4470_s6 + $0x40] sm:$0xff]  }
0x1005   :  { %v2544_v35 = vpack.c.bf16 %v2543_v32, %v2542_v34  ;;  %v3036_v31 = vld [vmem:[%s4472_s8 + $0x1] ss:$0 sm:$0xff] }
0x1007   :  { %3421 = vmatmul.mubr.msk.bf16.vlgmr.msra.gmra.mxu0 %vm174_vm4, %v2544_v35 }
0x1008   :  { %3448 = vmatprep.mubr.msk.bf16.mxu0 %vm3677_vm0, %v3676_v2  ;;  %3433 = vmatpush3.bf16.msra.mxu0 %v3559_v54 }
0x1009   :  { %3434 = vmatprep.subr.bf16.mxu0 %v3676_v2 }
0x100c   :  { %3435 = vmatpush3.bf16.msra.mxu0 %v3560_v55 }
0x100d   :  { %3436 = vmatprep.subr.bf16.mxu0 %v3676_v2 }
0x1010   :  { %3437 = vmatpush3.bf16.msra.mxu0 %v3561_v57 }
0x1011   :  { %3438 = vmatprep.subr.bf16.mxu0 %v3676_v2 }
0x1014   :  { %3439 = vmatpush3.bf16.msra.mxu0 %v3562_v11 }
0x1015   :  { %3440 = vmatprep.subr.bf16.mxu0 %v3676_v2 }
0x1018   :  { %3441 = vmatpush3.bf16.msra.mxu0 %v3563_v13 }
0x1019   :  { %3442 = vmatprep.subr.bf16.mxu0 %v3676_v2 }
0x101c   :  { %3443 = vmatpush3.bf16.msra.mxu0 %v3564_v53 }
0x101d   :  { %3444 = vmatprep.subr.bf16.mxu0 %v3676_v2 }
0x1020   :  { %3445 = vmatpush3.bf16.msra.mxu0 %v3565_v58 }
0x1021   :  { %3446 = vmatprep.subr.bf16.mxu0 %v3676_v2 }
0x1024   :  { %3447 = vmatpush3.bf16.msra.mxu0 %v3566_v47 }
0x10c7   :  { %v2594_v37 = vpop.f32.mrf.mxu0 }
0x10c8   :  { %v2601_v38 = vadd.f32 %v2594_v37, %v4129_v22 }
0x10c9   :  { %v3422_v39 = vpop.f32.mrf.mxu0 }
0x10ca   :  { %v4367_v40 = vadd.f32 %v2606_v36, %v2601_v38 }
0x10cb   :  { %v2597_v41 = vpop.f32.mrf.mxu0 }
0x10cc   :  { %v2602_v42 = vadd.f32 %v2597_v41, %v4136_v26  ;;  %v2609_v43 = vsel %vm174_vm4, %v4367_v40, 0.0  ;;  %v2617_v50 = vmul.f32 %v4367_v40, %v4367_v40  ;;  %v2811_v41 = vrot.slane %v4155_v20, %v1475_v21  ;;  %v3567_v20 = vld [vmem:[%s4474_s10 + $0x8] sm:$0xff]  }
0x10cd   :  { %2610 = vadd.xlane.f32.xlu0 %v2609_v43  ;;  %v3423_v52 = vpop.f32.mrf.mxu0 }
0x10ce   :  { %v4374_v10 = vadd.f32 %v2606_v36, %v2602_v42  ;;  %v2619_v3 = vsel %vm174_vm4, %v2617_v50, 0.0 }
0x10d0   :  { %v2612_v22 = vsel %vm174_vm4, %v4374_v10, 0.0  ;;  %v2618_v14 = vmul.f32 %v4374_v10, %v4374_v10 }
0x10d1   :  { %2620 = vadd.xlane.f32.xlu0 %v2619_v3  ;;  %2613 = vadd.xlane.f32.xlu1 %v2612_v22 }
0x10d2   :  { %v2622_v26 = vsel %vm174_vm4, %v2618_v14, 0.0 }
0x10d5   :  { %2623 = vadd.xlane.f32.xlu0 %v2622_v26 }
0x1156   :  { %v2611_v56 = vpop.xlane.xlu0 %2610 }
0x1157   :  { %v2615_v49 = vmul.f32 0.03125, %v2611_v56 }
0x1159   :  { %v2627_v60 = vmul.f32 %v2615_v49, %v2615_v49  ;;  %v2631_v25 = vsub.f32 %v4367_v40, %v2615_v49 }
0x115a   :  { %v2621_v46 = vpop.xlane.xlu0 %2620  ;;  %v2614_v59 = vpop.xlane.xlu1 %2613 }
0x115b   :  { %v2625_v62 = vmul.f32 0.03125, %v2621_v46  ;;  %v2616_v63 = vmul.f32 0.03125, %v2614_v59 }
0x115d   :  { %v2629_v1 = vsub.f32 %v2625_v62, %v2627_v60  ;;  %v2628_v5 = vmul.f32 %v2616_v63, %v2616_v63  ;;  %v2632_v12 = vsub.f32 %v4374_v10, %v2616_v63 }
0x115e   :  { %v2624_v4 = vpop.xlane.xlu0 %2623 }
0x115f   :  { %v2633_v19 = vadd.f32 1e-05, %v2629_v1  ;;  %v2626_v61 = vmul.f32 0.03125, %v2624_v4 }
0x1161   :  { %3645 = vrsqrt.f32 %v2633_v19  ;;  %v2630_v28 = vsub.f32 %v2626_v61, %v2628_v5 }
0x1163   :  { %v2634_v29 = vadd.f32 1e-05, %v2630_v28 }
0x1165   :  { %3647 = vrsqrt.f32 %v2634_v29 }
0x116e   :  { %v3646_v6 = vpop.eup %3645 }
0x116f   :  { %v2637_v9 = vmul.f32 %v3646_v6, %v2631_v25 }
0x1171   :  { %v2643_v18 = vmul.f32 %v2642_v0, %v2637_v9 }
0x1172   :  { %v3648_v15 = vpop.eup %3647 }
0x1173   :  { %v2638_v16 = vmul.f32 %v3648_v15, %v2632_v12  ;;  %v2649_v17 = vadd.f32 %v2648_v23, %v2643_v18 }
0x1175   :  { %v2644_v27 = vmul.f32 %v2642_v0, %v2638_v16 }
0x1177   :  { %v2650_v24 = vadd.f32 %v2648_v23, %v2644_v27  ;;  %v3048_v27 = vld [vmem:[%s4475_s11] ss:$0 sm:$0xff] }
0x1179   :  { %v2651_v30 = vpack.c.bf16 %v2650_v24, %v2649_v17 }
0x117b   :  { %3429 = vmatmul.mubr.msk.bf16.vlgmr.msra.gmra.mxu1 %vm174_vm4, %v2651_v30 }
0x117c   :  { %3456 = vmatprep.mubr.msk.bf16.mxu1 %vm3677_vm0, %v3676_v2  ;;  %3453 = vmatpush3.bf16.msra.mxu1 %v3567_v20 }
0x117d   :  { %3454 = vmatprep.subr.bf16.mxu1 %v3676_v2  ;;  %v2814_v2 = vld [vmem:[%s4473_s9] sm:$0x3]  ;;  %s3687_s9 = smov [#allocation2]  }
0x117e   :  { %v2848_v29 = vrot.slane %v2814_v2, %v3818_v45  ;;  %v2854_v12 = vrot.slane %v2814_v2, %v3829_v51  ;;  %s2932_s30 = sshll.u32 %s3687_s9, 4  ;;  %s2933_s30 = int_to_ptr.vmem [resolvable:$true] %s2932_s30 }
0x117f   :  { %s3653_s0 = scalar_lea.vmem %s2933_s30, 256  ;;  %p3658_p1 = scmp.lt.s32.totalorder %s2933_s30, %s2933_s30 }
0x1180   :  { %p3654_p0 = scmp.ne.s32.totalorder %s2933_s30, %s3653_s0  ;;  %p3659_p2 = scmp.lt.s32.totalorder %s3653_s0, %s3653_s0 }
0x1182   :  { %p3660_p3 = por %p3659_p2, %p3658_p1 }
0x1184   :  { %p3661_p4 = pnand %p3660_p3, %p3654_p0 }
0x123b   :  { %v2707_v7 = vpop.f32.mrf.mxu1 }
0x123c   :  { %v2708_v32 = vadd.f32 %v3036_v31, %v2707_v7 }
0x123d   :  { %v3430_v8 = vpop.f32.mrf.mxu1 }
0x123e   :  { %v2714_v37 = vmax.f32 %v2708_v32, 0.0 }
0x123f   :  { %v2710_v34 = vpop.f32.mrf.mxu1 }
0x1240   :  { %v2711_v35 = vadd.f32 %v3036_v31, %v2710_v34 }
0x1241   :  { %v3431_v36 = vpop.f32.mrf.mxu1 }
0x1242   :  { %v2715_v38 = vmax.f32 %v2711_v35, 0.0 }
0x1244   :  { %v2716_v39 = vpack.c.bf16 %v2715_v38, %v2714_v37 }
0x1246   :  { %3449 = vmatmul.mubr.bf16.vlgmr.msra.gmra.mxu0 %v2716_v39 }
0x1306   :  { %v2799_v42 = vpop.f32.mrf.mxu0 }
0x1307   :  { %v2806_v43 = vadd.f32 %v2799_v42, %v4367_v40  ;;  %v3568_v40 = vld [vmem:[%s4474_s10] sm:$0xff]  }
0x1308   :  { %v3450_v50 = vpop.f32.mrf.mxu0  ;;  %3455 = vmatpush3.bf16.msra.mxu1 %v3568_v40 }
0x1309   :  { %v2812_v52 = vadd.f32 %v2811_v41, %v2806_v43 }
0x130a   :  { %v2802_v3 = vpop.f32.mrf.mxu0 }
0x130b   :  { %v2807_v22 = vadd.f32 %v2802_v3, %v4374_v10  ;;  %v2815_v14 = vsel %vm174_vm4, %v2812_v52, 0.0  ;;  %v2823_v26 = vmul.f32 %v2812_v52, %v2812_v52 }
0x130c   :  { %2816 = vadd.xlane.f32.xlu1 %v2815_v14  ;;  %v3451_v33 = vpop.f32.mrf.mxu0 }
0x130d   :  { %v2813_v48 = vadd.f32 %v2811_v41, %v2807_v22  ;;  %v2825_v54 = vsel %vm174_vm4, %v2823_v26, 0.0 }
0x130f   :  { %v2818_v44 = vsel %vm174_vm4, %v2813_v48, 0.0  ;;  %v2824_v55 = vmul.f32 %v2813_v48, %v2813_v48 }
0x1310   :  { %2826 = vadd.xlane.f32.xlu1 %v2825_v54  ;;  %2819 = vadd.xlane.f32.xlu0 %v2818_v44 }
0x1311   :  { %v2828_v21 = vsel %vm174_vm4, %v2824_v55, 0.0 }
0x1314   :  { %2829 = vadd.xlane.f32.xlu0 %v2828_v21 }
0x1395   :  { %v2817_v10 = vpop.xlane.xlu1 %2816 }
0x1396   :  { %v2821_v57 = vmul.f32 0.03125, %v2817_v10 }
0x1398   :  { %v2833_v56 = vmul.f32 %v2821_v57, %v2821_v57  ;;  %v2837_v5 = vsub.f32 %v2812_v52, %v2821_v57 }
0x1399   :  { %v2827_v11 = vpop.xlane.xlu1 %2826  ;;  %v2820_v13 = vpop.xlane.xlu0 %2819 }
0x139a   :  { %v2831_v49 = vmul.f32 0.03125, %v2827_v11  ;;  %v2822_v46 = vmul.f32 0.03125, %v2820_v13 }
0x139c   :  { %v2835_v59 = vsub.f32 %v2831_v49, %v2833_v56  ;;  %v2834_v63 = vmul.f32 %v2822_v46, %v2822_v46  ;;  %v2838_v25 = vsub.f32 %v2813_v48, %v2822_v46 }
0x139d   :  { %v2830_v60 = vpop.xlane.xlu0 %2829 }
0x139e   :  { %v2839_v62 = vadd.f32 1e-05, %v2835_v59  ;;  %v2832_v1 = vmul.f32 0.03125, %v2830_v60 }
0x13a0   :  { %3649 = vrsqrt.f32 %v2839_v62  ;;  %v2836_v4 = vsub.f32 %v2832_v1, %v2834_v63 }
0x13a2   :  { %v2840_v19 = vadd.f32 1e-05, %v2836_v4 }
0x13a4   :  { %3651 = vrsqrt.f32 %v2840_v19 }
0x13ad   :  { %v3650_v61 = vpop.eup %3649 }
0x13ae   :  { %v2843_v28 = vmul.f32 %v3650_v61, %v2837_v5 }
0x13b0   :  { %v2849_v0 = vmul.f32 %v2848_v29, %v2843_v28 }
0x13b1   :  { %v3652_v6 = vpop.eup %3651 }
0x13b2   :  { %v2844_v9 = vmul.f32 %v3652_v6, %v2838_v25  ;;  %v2855_v16 = vadd.f32 %v2854_v12, %v2849_v0 }
0x13b4   :  { %v2850_v15 = vmul.f32 %v2848_v29, %v2844_v9 }
0x13b6   :  { %v2856_v18 = vadd.f32 %v2854_v12, %v2850_v15 }
0x13b8   :  { %v2857_v23 = vpack.c.bf16 %v2856_v18, %v2855_v16 }
0x13ba   :  { %3457 = vmatmul.mubr.msk.bf16.vlgmr.msra.gmra.mxu1 %vm174_vm4, %v2857_v23 }
0x147a   :  { %v2918_v17 = vpop.f32.mrf.mxu1 }
0x147b   :  { %v2919_v24 = vadd.f32 %v3048_v27, %v2918_v17 }
0x147c   :  { %v3458_v30 = vpop.f32.mrf.mxu1 }
0x147d   :  { %2925 = vst [vmem:[#allocation2] sm:$0xff] %v2919_v24 }
0x147e   :  { %v2921_v45 = vpop.f32.mrf.mxu1 }
0x147f   :  { %v2922_v53 = vadd.f32 %v3048_v27, %v2921_v45 }
0x1480   :  { %v3459_v51 = vpop.f32.mrf.mxu1 }
0x1481   :  { %2926 = vst [vmem:[#allocation2 + $0x8] sm:$0xff] %v2922_v53 }
0x1482   :  { %3664 = shalt.err (!%p3661_p4)
}
0x1483   :  { %s3688_s1 = smov 128  }
0x1484   :  { %2938 = dma.vmem_to_hbm [thread:$0]  %s2933_s30, 256, %s4476_s12, [#allocation3], %s3688_s1, %s3688_s1, %s3684_s25  }
0x1485   :  { %3673 = dma.done.wait [#allocation3], 256  }
0x1486   :  { %3674 = vsyncadd [#allocation3], 4294967040 }
0x1487   :  { %2942 = vsyncpa [#allocation3], 1 }

</bundles_post_ra>
